<compile_context>
chip_gen: v7x
topology: tpu7x:2x2x1
jax: 0.10.0
libtpu: 0.0.40
codegen_flags: <defaults>
</compile_context>

<pallas_src>
import math
import functools

import jax
import jax.numpy as jnp
from jax.experimental import pallas as pl
from jax.experimental.pallas import tpu as pltpu


# ------------------------------------------------------------------ kernel ----
def _layer_norm(z, g, b, eps=1e-5):
    mu = jnp.mean(z, axis=-1, keepdims=True)
    var = jnp.mean((z - mu) ** 2, axis=-1, keepdims=True)
    return (z - mu) * jax.lax.rsqrt(var + eps) * g + b


def fused_encoder_kernel(bias_ref, x_ref, wqkv_ref, bqkv_ref, wo_ref, bo_ref, lnp_ref,
                         o_ref, *, h, d_k, d_v, eps=1e-5):
    """One grid step = one batch block through ALL encoder layers.

    bias_ref : (bb, 1, S)        f32   additive key mask (0 / -1e30), layer-invariant
    x_ref    : (bb, S, D)        f32   input activation
    wqkv_ref : (L, D, 3*h*d_k)   bf16  fused Q|K|V projection weights (h-major per block)
    bqkv_ref : (L, 1, 3*h*d_k)   f32
    wo_ref   : (L, h*d_v, D)     bf16  output projection (rows h-major, like fc_o)
    bo_ref   : (L, 1, D)         f32
    lnp_ref  : (L, 4, D)         f32   rows: [gamma1, beta1, gamma2, beta2]
    o_ref    : (bb, S, D)        f32
    """
    bb, S, D = x_ref.shape
    L = wqkv_ref.shape[0]
    HK, HV = h * d_k, h * d_v
    inv_sqrt_dk = 1.0 / math.sqrt(d_k)

    # ---- loop-invariants (hoisted) -------------------------------------------------
    bias3 = bias_ref[...]                                   # (bb, 1, S)
    if bb == 1:
        bias_n = bias3                                      # broadcasts over (h, S, S)
    else:
        # head-major batch axis n = head*bb + b  ->  tile the per-batch bias h times
        bias_n = jnp.concatenate([bias3] * h, axis=0)       # (h*bb, 1, S)

    x = x_ref[...].astype(jnp.float32)                      # (bb, S, D) activation carry

    # Layer loop fully inside the kernel; L is tiny so a fully-unrolled (static) loop is
    # equivalent to lax.fori_loop(..., unroll=True) and keeps every weight VMEM-resident.
    for l in range(L):
        wqkv = wqkv_ref[l]                                  # (D, 3*HK) bf16
        bqkv = bqkv_ref[l]                                  # (1, 3*HK) f32
        wo = wo_ref[l]                                      # (HV, D)   bf16
        bo = bo_ref[l]                                      # (1, D)    f32
        lnp = lnp_ref[l]                                    # (4, D)    f32
        g1, be1 = lnp[0:1, :], lnp[1:2, :]
        g2, be2 = lnp[2:3, :], lnp[3:4, :]

        x2d = x.reshape(bb * S, D)

        # ---- fused Q/K/V projection: one (bb*S, D) @ (D, 3*h*d_k) MXU push ----------
        qkv = jnp.dot(x2d.astype(jnp.bfloat16), wqkv,
                      preferred_element_type=jnp.float32) + bqkv     # (bb*S, 3*HK) f32

        def split_heads(base, dd):
            # static lane slices of the fused result; head-major batch axis n = head*bb+b
            return jnp.concatenate(
                [qkv[:, base + i * dd: base + (i + 1) * dd].reshape(bb, S, dd)
                 for i in range(h)],
                axis=0)                                              # (h*bb, S, dd)

        q_n = split_heads(0, d_k)
        k_n = split_heads(HK, d_k)
        v_n = split_heads(2 * HK, d_v)

        # ---- scaled dot-product attention (per (b, h), batched over n) --------------
        att = jnp.einsum('nqd,nkd->nqk',
                         q_n.astype(jnp.bfloat16), k_n.astype(jnp.bfloat16),
                         preferred_element_type=jnp.float32) * inv_sqrt_dk
        att = att + bias_n                                           # additive key mask

        att_max = jnp.max(att, axis=-1, keepdims=True)               # f32 softmax
        p = jnp.exp(att - att_max)
        p = p * pl.reciprocal(jnp.sum(p, axis=-1, keepdims=True), approx=True)

        oh = jnp.einsum('nqk,nkd->nqd',
                        p.astype(jnp.bfloat16), v_n.astype(jnp.bfloat16),
                        preferred_element_type=jnp.float32)          # (h*bb, S, d_v)

        # ---- merge heads into lanes (h-major, fc_o order) + ONE projection matmul ----
        oh2d = jnp.concatenate(
            [oh[i * bb:(i + 1) * bb].reshape(bb * S, d_v) for i in range(h)],
            axis=-1)                                                 # (bb*S, HV)
        attn = jnp.dot(oh2d.astype(jnp.bfloat16), wo,
                       preferred_element_type=jnp.float32) + bo      # (bb*S, D)
        attn = attn.reshape(bb, S, D)

        y1 = _layer_norm(x + attn, g1, be1, eps)     # MultiHeadAttention.layer_norm
        y2 = _layer_norm(x + y1, g2, be2, eps)       # EncoderLayer.lnorm
        x = y2

    o_ref[...] = x.astype(o_ref.dtype)               # single HBM writeback


# ----------------------------------------------------------------- wrapper ----
def multi_level_encoder(x, params, padding_idx, *, h, d_k, d_v, batch_block=1):
    """x: (B, S, D) f32; params: fused/stacked per-layer weights (leading axis = layer).

    Returns (out, attention_mask) like the PyTorch module.
    batch_block=1 makes the (parallel) grid size B so v7x's second TensorCore gets work.
    """
    B, S, D = x.shape
    assert B % batch_block == 0
    bb = batch_block

    # Mask from the ORIGINAL input, reused by every layer (matches the module).
    mask_bool = (jnp.sum(x, axis=-1) == padding_idx)                          # (B, S)
    bias = jnp.where(mask_bool, -1e30, 0.0).astype(jnp.float32)[:, None, :]   # (B, 1, S)

    def full_spec(arr):
        ndim = arr.ndim
        return pl.BlockSpec(arr.shape, lambda i, n=ndim: (0,) * n)   # constant block index

    w_names = ["wqkv", "bqkv", "wo", "bo", "lnp"]
    w_args = [params[n] for n in w_names]

    kernel = functools.partial(fused_encoder_kernel, h=h, d_k=d_k, d_v=d_v)

    out = pl.pallas_call(
        kernel,
        out_shape=jax.ShapeDtypeStruct((B, S, D), jnp.float32),
        grid_spec=pltpu.PrefetchScalarGridSpec(
            num_scalar_prefetch=0,
            grid=(B // bb,),                                          # batch-parallel only
            in_specs=[pl.BlockSpec((bb, 1, S), lambda i: (i, 0, 0)),  # additive key mask
                      pl.BlockSpec((bb, S, D), lambda i: (i, 0, 0))]  # input activation
                     + [full_spec(a) for a in w_args],                # weights: DMA'd once
            out_specs=pl.BlockSpec((bb, S, D), lambda i: (i, 0, 0)),
        ),
        compiler_params=pltpu.CompilerParams(
            dimension_semantics=("parallel",)),
    )(bias, x, *w_args)

    attention_mask = mask_bool[:, None, None, :]                      # (B, 1, 1, S)
    return out, attention_mask


# ------------------------------------------------------------------- setup ----
def init_stacked_params(key, n_layers, d_model, d_k, d_v, h):
    """Fused, layer-stacked parameters.

    wqkv columns: [Q | K | V], each block h-major (head*d_k + dk), matching torch's
    .view(b, n, h, d_k).  wo rows: h-major (head*d_v + dv), matching fc_o's input.
    Biases / LN params get small non-zero values so the fused-layout plumbing is exercised
    by the reference check (the torch module inits them to 0/1; forward semantics identical).
    """
    def xavier(k, shape, fan_in, fan_out):
        limit = math.sqrt(6.0 / (fan_in + fan_out))
        return jax.random.uniform(k, shape, jnp.float32, -limit, limit)

    L, D = n_layers, d_model
    HK, HV = h * d_k, h * d_v
    kq, kk, kv, ko, kb1, kb2, kg1, kg2, kc1, kc2 = jax.random.split(key, 10)

    wq = xavier(kq, (L, D, HK), D, HK)
    wk = xavier(kk, (L, D, HK), D, HK)
    wv = xavier(kv, (L, D, HV), D, HV)
    wo = xavier(ko, (L, HV, D), HV, D)

    g1 = 1.0 + 0.05 * jax.random.normal(kg1, (L, D), jnp.float32)
    g2 = 1.0 + 0.05 * jax.random.normal(kg2, (L, D), jnp.float32)
    be1 = 0.05 * jax.random.normal(kc1, (L, D), jnp.float32)
    be2 = 0.05 * jax.random.normal(kc2, (L, D), jnp.float32)

    return {
        "wqkv": jnp.concatenate([wq, wk, wv], axis=-1).astype(jnp.bfloat16),  # (L, D, 2HK+HV)
        "bqkv": 0.02 * jax.random.normal(kb1, (L, 1, 2 * HK + HV), jnp.float32),
        "wo": wo.astype(jnp.bfloat16),                                        # (L, HV, D)
        "bo": 0.02 * jax.random.normal(kb2, (L, 1, D), jnp.float32),
        "lnp": jnp.stack([g1, be1, g2, be2], axis=1),                         # (L, 4, D)
    }


def reference_forward(x, params, padding_idx, *, h, d_k, d_v, eps=1e-5):
    """Pure-JAX f32 reference of the module forward (same fused params, 4-D head layout)."""
    B, S, D = x.shape
    HK, HV = h * d_k, h * d_v
    mask = (jnp.sum(x, axis=-1) == padding_idx)                       # (B, S)
    bias = jnp.where(mask, -1e30, 0.0)[:, None, None, :]              # (B, 1, 1, S)
    L = params["wqkv"].shape[0]

    def ln(z, g, b):
        mu = jnp.mean(z, -1, keepdims=True)
        var = jnp.mean((z - mu) ** 2, -1, keepdims=True)
        return (z - mu) / jnp.sqrt(var + eps) * g + b

    out = x
    for l in range(L):
        wqkv = params["wqkv"][l].astype(jnp.float32)
        wo = params["wo"][l].astype(jnp.float32)
        bqkv, bo = params["bqkv"][l], params["bo"][l]
        lnp = params["lnp"][l]
        g1, be1, g2, be2 = lnp[0], lnp[1], lnp[2], lnp[3]

        qkv = out @ wqkv + bqkv                                                   # (B,S,3HK)
        q = qkv[..., :HK].reshape(B, S, h, d_k).transpose(0, 2, 1, 3)             # (B,h,S,dk)
        k = qkv[..., HK:2 * HK].reshape(B, S, h, d_k).transpose(0, 2, 1, 3)
        v = qkv[..., 2 * HK:].reshape(B, S, h, d_v).transpose(0, 2, 1, 3)

        att = jnp.einsum('bhqd,bhkd->bhqk', q, k) / math.sqrt(d_k) + bias
        p = jax.nn.softmax(att, axis=-1)
        oh = jnp.einsum('bhqk,bhkd->bhqd', p, v)                                  # (B,h,S,dv)
        oh = oh.transpose(0, 2, 1, 3).reshape(B, S, HV)
        attn = oh @ wo + bo

        y1 = ln(out + attn, g1, be1)
        y2 = ln(out + y1, g2, be2)
        out = y2
    return out, mask[:, None, None, :]


if __name__ == "__main__":
    # Small shapes consistent with the module's forward.
    B, S, D = 2, 8, 32            # batch, sequence, d_model
    N_LAYERS, H, DK, DV = 2, 4, 8, 8
    PADDING_IDX = 0

    key = jax.random.PRNGKey(0)
    k_x, k_p = jax.random.split(key)
    x = jax.random.normal(k_x, (B, S, D), jnp.float32)
    # make one token a "padding" token so the attention mask is exercised
    x = x.at[0, -1, :].set(0.0)

    params = init_stacked_params(k_p, N_LAYERS, D, DK, DV, H)

    out, attention_mask = multi_level_encoder(x, params, PADDING_IDX, h=H, d_k=DK, d_v=DV)
    jax.block_until_ready(out)
    jax.block_until_ready(attention_mask)

    ref_out, ref_mask = reference_forward(x, params, PADDING_IDX, h=H, d_k=DK, d_v=DV)

    assert out.shape == (B, S, D)
    assert attention_mask.shape == (B, 1, 1, S)
    assert bool(attention_mask[0, 0, 0, -1]) and not bool(attention_mask[0, 0, 0, 0])
    assert bool(jnp.all(attention_mask == ref_mask))
    assert bool(jnp.all(jnp.isfinite(out)))
    # bf16 matmul inputs (f32 accumulation) + approx reciprocal -> loose but meaningful
    # tolerance vs the f32 reference.
    rel_err = float(jnp.linalg.norm(out - ref_out) / jnp.linalg.norm(ref_out))
    assert rel_err < 0.15, f"relative L2 error vs reference too large: {rel_err}"
    print("KERNEL_OK")
</pallas_src>

<mosaic_0001>
module attributes {stable_mosaic.version = 11 : i64} {
  func.func @fused_encoder_kernel(%arg0: i32, %arg1: memref<1x1x8xf32, #tpu.memory_space<vmem>>, %arg2: memref<1x8x32xf32, #tpu.memory_space<vmem>>, %arg3: memref<2x32x96xbf16, #tpu.memory_space<vmem>>, %arg4: memref<2x1x96xf32, #tpu.memory_space<vmem>>, %arg5: memref<2x32x32xbf16, #tpu.memory_space<vmem>>, %arg6: memref<2x1x32xf32, #tpu.memory_space<vmem>>, %arg7: memref<2x4x32xf32, #tpu.memory_space<vmem>>, %arg8: memref<1x8x32xf32, #tpu.memory_space<vmem>>) attributes {dimension_semantics = [#tpu.dimension_semantics<parallel>], iteration_bounds = array<i64: 2>, scalar_prefetch = 0 : i64, scratch_operands = 0 : i64, tpu.core_type = #tpu.core_type<tc>, window_params = [{transform_indices = @transform_0, window_bounds = array<i64: 1, 1, 8>}, {transform_indices = @transform_1, window_bounds = array<i64: 1, 8, 32>}, {pipeline_mode = #tpu.pipeline_mode<synchronous>, transform_indices = @transform_2, window_bounds = array<i64: 2, 32, 96>}, {pipeline_mode = #tpu.pipeline_mode<synchronous>, transform_indices = @transform_3, window_bounds = array<i64: 2, 1, 96>}, {pipeline_mode = #tpu.pipeline_mode<synchronous>, transform_indices = @transform_4, window_bounds = array<i64: 2, 32, 32>}, {pipeline_mode = #tpu.pipeline_mode<synchronous>, transform_indices = @transform_5, window_bounds = array<i64: 2, 1, 32>}, {pipeline_mode = #tpu.pipeline_mode<synchronous>, transform_indices = @transform_6, window_bounds = array<i64: 2, 4, 32>}, {transform_indices = @transform_7, window_bounds = array<i64: 1, 8, 32>}]} {
    %c0 = arith.constant 0 : index
    %c0_0 = arith.constant 0 : index
    %c0_1 = arith.constant 0 : index
    %0 = vector.load %arg1[%c0, %c0_0, %c0_1] : memref<1x1x8xf32, #tpu.memory_space<vmem>>, vector<1x1x8xf32>
    %c0_2 = arith.constant 0 : index
    %c0_3 = arith.constant 0 : index
    %c0_4 = arith.constant 0 : index
    %1 = vector.load %arg2[%c0_2, %c0_3, %c0_4] : memref<1x8x32xf32, #tpu.memory_space<vmem>>, vector<1x8x32xf32>
    %c0_5 = arith.constant 0 : index
    %c0_6 = arith.constant 0 : index
    %c0_7 = arith.constant 0 : index
    %2 = vector.load %arg3[%c0_5, %c0_6, %c0_7] : memref<2x32x96xbf16, #tpu.memory_space<vmem>>, vector<1x32x96xbf16>
    %3 = vector.shape_cast %2 : vector<1x32x96xbf16> to vector<32x96xbf16>
    %c0_8 = arith.constant 0 : index
    %c0_9 = arith.constant 0 : index
    %c0_10 = arith.constant 0 : index
    %4 = vector.load %arg4[%c0_8, %c0_9, %c0_10] : memref<2x1x96xf32, #tpu.memory_space<vmem>>, vector<1x1x96xf32>
    %5 = vector.shape_cast %4 : vector<1x1x96xf32> to vector<1x96xf32>
    %c0_11 = arith.constant 0 : index
    %c0_12 = arith.constant 0 : index
    %c0_13 = arith.constant 0 : index
    %6 = vector.load %arg5[%c0_11, %c0_12, %c0_13] : memref<2x32x32xbf16, #tpu.memory_space<vmem>>, vector<1x32x32xbf16>
    %7 = vector.shape_cast %6 : vector<1x32x32xbf16> to vector<32x32xbf16>
    %c0_14 = arith.constant 0 : index
    %c0_15 = arith.constant 0 : index
    %c0_16 = arith.constant 0 : index
    %8 = vector.load %arg6[%c0_14, %c0_15, %c0_16] : memref<2x1x32xf32, #tpu.memory_space<vmem>>, vector<1x1x32xf32>
    %9 = vector.shape_cast %8 : vector<1x1x32xf32> to vector<1x32xf32>
    %c0_17 = arith.constant 0 : index
    %c0_18 = arith.constant 0 : index
    %c0_19 = arith.constant 0 : index
    %10 = vector.load %arg7[%c0_17, %c0_18, %c0_19] : memref<2x4x32xf32, #tpu.memory_space<vmem>>, vector<1x4x32xf32>
    %11 = vector.shape_cast %10 : vector<1x4x32xf32> to vector<4x32xf32>
    %12 = vector.extract_strided_slice %11 {offsets = [0, 0], sizes = [1, 32], strides = [1, 1]} : vector<4x32xf32> to vector<1x32xf32>
    %13 = vector.extract_strided_slice %11 {offsets = [1, 0], sizes = [1, 32], strides = [1, 1]} : vector<4x32xf32> to vector<1x32xf32>
    %14 = vector.extract_strided_slice %11 {offsets = [2, 0], sizes = [1, 32], strides = [1, 1]} : vector<4x32xf32> to vector<1x32xf32>
    %15 = vector.extract_strided_slice %11 {offsets = [3, 0], sizes = [1, 32], strides = [1, 1]} : vector<4x32xf32> to vector<1x32xf32>
    %16 = vector.shape_cast %1 : vector<1x8x32xf32> to vector<8x32xf32>
    %17 = arith.truncf %16 : vector<8x32xf32> to vector<8x32xbf16>
    %cst = arith.constant dense<0.000000e+00> : vector<8x96xf32>
    %18 = tpu.matmul %17, %3, %cst {dimension_numbers = #tpu.dot_dimension_numbers<[1], [0], [0], [1], [0, 0, 1, 1], [], []>} : vector<8x32xbf16>, vector<32x96xbf16>, vector<8x96xf32> -> vector<8x96xf32>
    %19 = vector.broadcast %5 : vector<1x96xf32> to vector<8x96xf32>
    %20 = arith.addf %18, %19 : vector<8x96xf32>
    %21 = vector.extract_strided_slice %20 {offsets = [0, 0], sizes = [8, 8], strides = [1, 1]} : vector<8x96xf32> to vector<8x8xf32>
    %22 = vector.shape_cast %21 : vector<8x8xf32> to vector<1x8x8xf32>
    %23 = vector.extract_strided_slice %20 {offsets = [0, 8], sizes = [8, 8], strides = [1, 1]} : vector<8x96xf32> to vector<8x8xf32>
    %24 = vector.shape_cast %23 : vector<8x8xf32> to vector<1x8x8xf32>
    %25 = vector.extract_strided_slice %20 {offsets = [0, 16], sizes = [8, 8], strides = [1, 1]} : vector<8x96xf32> to vector<8x8xf32>
    %26 = vector.shape_cast %25 : vector<8x8xf32> to vector<1x8x8xf32>
    %27 = vector.extract_strided_slice %20 {offsets = [0, 24], sizes = [8, 8], strides = [1, 1]} : vector<8x96xf32> to vector<8x8xf32>
    %28 = vector.shape_cast %27 : vector<8x8xf32> to vector<1x8x8xf32>
    %29 = tpu.concatenate %22, %24, %26, %28 in 0 : vector<1x8x8xf32>, vector<1x8x8xf32>, vector<1x8x8xf32>, vector<1x8x8xf32> -> vector<4x8x8xf32>
    %30 = vector.extract_strided_slice %20 {offsets = [0, 32], sizes = [8, 8], strides = [1, 1]} : vector<8x96xf32> to vector<8x8xf32>
    %31 = vector.shape_cast %30 : vector<8x8xf32> to vector<1x8x8xf32>
    %32 = vector.extract_strided_slice %20 {offsets = [0, 40], sizes = [8, 8], strides = [1, 1]} : vector<8x96xf32> to vector<8x8xf32>
    %33 = vector.shape_cast %32 : vector<8x8xf32> to vector<1x8x8xf32>
    %34 = vector.extract_strided_slice %20 {offsets = [0, 48], sizes = [8, 8], strides = [1, 1]} : vector<8x96xf32> to vector<8x8xf32>
    %35 = vector.shape_cast %34 : vector<8x8xf32> to vector<1x8x8xf32>
    %36 = vector.extract_strided_slice %20 {offsets = [0, 56], sizes = [8, 8], strides = [1, 1]} : vector<8x96xf32> to vector<8x8xf32>
    %37 = vector.shape_cast %36 : vector<8x8xf32> to vector<1x8x8xf32>
    %38 = tpu.concatenate %31, %33, %35, %37 in 0 : vector<1x8x8xf32>, vector<1x8x8xf32>, vector<1x8x8xf32>, vector<1x8x8xf32> -> vector<4x8x8xf32>
    %39 = vector.extract_strided_slice %20 {offsets = [0, 64], sizes = [8, 8], strides = [1, 1]} : vector<8x96xf32> to vector<8x8xf32>
    %40 = vector.shape_cast %39 : vector<8x8xf32> to vector<1x8x8xf32>
    %41 = vector.extract_strided_slice %20 {offsets = [0, 72], sizes = [8, 8], strides = [1, 1]} : vector<8x96xf32> to vector<8x8xf32>
    %42 = vector.shape_cast %41 : vector<8x8xf32> to vector<1x8x8xf32>
    %43 = vector.extract_strided_slice %20 {offsets = [0, 80], sizes = [8, 8], strides = [1, 1]} : vector<8x96xf32> to vector<8x8xf32>
    %44 = vector.shape_cast %43 : vector<8x8xf32> to vector<1x8x8xf32>
    %45 = vector.extract_strided_slice %20 {offsets = [0, 88], sizes = [8, 8], strides = [1, 1]} : vector<8x96xf32> to vector<8x8xf32>
    %46 = vector.shape_cast %45 : vector<8x8xf32> to vector<1x8x8xf32>
    %47 = tpu.concatenate %40, %42, %44, %46 in 0 : vector<1x8x8xf32>, vector<1x8x8xf32>, vector<1x8x8xf32>, vector<1x8x8xf32> -> vector<4x8x8xf32>
    %48 = arith.truncf %29 : vector<4x8x8xf32> to vector<4x8x8xbf16>
    %49 = arith.truncf %38 : vector<4x8x8xf32> to vector<4x8x8xbf16>
    "tpu.trace_start"() <{level = 10 : i32, message = "nqd,nkd->nqk"}> : () -> ()
    %cst_20 = arith.constant dense<0.000000e+00> : vector<4x8x8xf32>
    %50 = tpu.matmul %48, %49, %cst_20 {dimension_numbers = #tpu.dot_dimension_numbers<[2], [2], [1], [1], [0, 0, 0, 1, 1, 1], [0], [0]>} : vector<4x8x8xbf16>, vector<4x8x8xbf16>, vector<4x8x8xf32> -> vector<4x8x8xf32>
    "tpu.trace_stop"() : () -> ()
    %cst_21 = arith.constant 0.353553385 : f32
    %51 = vector.broadcast %cst_21 : f32 to vector<4x8x8xf32>
    %52 = arith.mulf %50, %51 : vector<4x8x8xf32>
    %53 = vector.broadcast %0 : vector<1x1x8xf32> to vector<4x8x8xf32>
    %54 = arith.addf %52, %53 : vector<4x8x8xf32>
    %cst_22 = arith.constant dense<0xFF800000> : vector<4x8xf32>
    %55 = vector.multi_reduction <maximumf>, %54, %cst_22 [2] : vector<4x8x8xf32> to vector<4x8xf32>
    %56 = vector.shape_cast %55 : vector<4x8xf32> to vector<4x8x1xf32>
    %57 = vector.broadcast %56 : vector<4x8x1xf32> to vector<4x8x8xf32>
    %58 = arith.subf %54, %57 : vector<4x8x8xf32>
    %59 = math.exp %58 : vector<4x8x8xf32>
    %cst_23 = arith.constant dense<0.000000e+00> : vector<4x8xf32>
    %60 = vector.multi_reduction <add>, %59, %cst_23 [2] : vector<4x8x8xf32> to vector<4x8xf32>
    %61 = vector.shape_cast %60 : vector<4x8xf32> to vector<4x8x1xf32>
    %62 = tpu.reciprocal %61 {approx = true} : vector<4x8x1xf32> -> vector<4x8x1xf32>
    %63 = vector.broadcast %62 : vector<4x8x1xf32> to vector<4x8x8xf32>
    %64 = arith.mulf %59, %63 : vector<4x8x8xf32>
    %65 = arith.truncf %64 : vector<4x8x8xf32> to vector<4x8x8xbf16>
    %66 = arith.truncf %47 : vector<4x8x8xf32> to vector<4x8x8xbf16>
    "tpu.trace_start"() <{level = 10 : i32, message = "nqk,nkd->nqd"}> : () -> ()
    %cst_24 = arith.constant dense<0.000000e+00> : vector<4x8x8xf32>
    %67 = tpu.matmul %65, %66, %cst_24 {dimension_numbers = #tpu.dot_dimension_numbers<[2], [1], [1], [2], [0, 0, 0, 1, 1, 2], [0], [0]>} : vector<4x8x8xbf16>, vector<4x8x8xbf16>, vector<4x8x8xf32> -> vector<4x8x8xf32>
    "tpu.trace_stop"() : () -> ()
    %68 = vector.extract_strided_slice %67 {offsets = [0, 0, 0], sizes = [1, 8, 8], strides = [1, 1, 1]} : vector<4x8x8xf32> to vector<1x8x8xf32>
    %69 = vector.shape_cast %68 : vector<1x8x8xf32> to vector<8x8xf32>
    %70 = vector.extract_strided_slice %67 {offsets = [1, 0, 0], sizes = [1, 8, 8], strides = [1, 1, 1]} : vector<4x8x8xf32> to vector<1x8x8xf32>
    %71 = vector.shape_cast %70 : vector<1x8x8xf32> to vector<8x8xf32>
    %72 = vector.extract_strided_slice %67 {offsets = [2, 0, 0], sizes = [1, 8, 8], strides = [1, 1, 1]} : vector<4x8x8xf32> to vector<1x8x8xf32>
    %73 = vector.shape_cast %72 : vector<1x8x8xf32> to vector<8x8xf32>
    %74 = vector.extract_strided_slice %67 {offsets = [3, 0, 0], sizes = [1, 8, 8], strides = [1, 1, 1]} : vector<4x8x8xf32> to vector<1x8x8xf32>
    %75 = vector.shape_cast %74 : vector<1x8x8xf32> to vector<8x8xf32>
    %76 = tpu.concatenate %69, %71, %73, %75 in 1 : vector<8x8xf32>, vector<8x8xf32>, vector<8x8xf32>, vector<8x8xf32> -> vector<8x32xf32>
    %77 = arith.truncf %76 : vector<8x32xf32> to vector<8x32xbf16>
    %cst_25 = arith.constant dense<0.000000e+00> : vector<8x32xf32>
    %78 = tpu.matmul %77, %7, %cst_25 {dimension_numbers = #tpu.dot_dimension_numbers<[1], [0], [0], [1], [0, 0, 1, 1], [], []>} : vector<8x32xbf16>, vector<32x32xbf16>, vector<8x32xf32> -> vector<8x32xf32>
    %79 = vector.broadcast %9 : vector<1x32xf32> to vector<8x32xf32>
    %80 = arith.addf %78, %79 : vector<8x32xf32>
    %81 = vector.shape_cast %80 : vector<8x32xf32> to vector<1x8x32xf32>
    %82 = arith.addf %1, %81 : vector<1x8x32xf32>
    %cst_26 = arith.constant dense<0.000000e+00> : vector<1x8xf32>
    %83 = vector.multi_reduction <add>, %82, %cst_26 [2] : vector<1x8x32xf32> to vector<1x8xf32>
    %84 = vector.shape_cast %83 : vector<1x8xf32> to vector<1x8x1xf32>
    %cst_27 = arith.constant 3.200000e+01 : f32
    %85 = vector.broadcast %cst_27 : f32 to vector<1x8x1xf32>
    %86 = arith.divf %84, %85 : vector<1x8x1xf32>
    %87 = vector.broadcast %86 : vector<1x8x1xf32> to vector<1x8x32xf32>
    %88 = arith.subf %82, %87 : vector<1x8x32xf32>
    %89 = arith.mulf %88, %88 : vector<1x8x32xf32>
    %cst_28 = arith.constant dense<0.000000e+00> : vector<1x8xf32>
    %90 = vector.multi_reduction <add>, %89, %cst_28 [2] : vector<1x8x32xf32> to vector<1x8xf32>
    %91 = vector.shape_cast %90 : vector<1x8xf32> to vector<1x8x1xf32>
    %cst_29 = arith.constant 3.200000e+01 : f32
    %92 = vector.broadcast %cst_29 : f32 to vector<1x8x1xf32>
    %93 = arith.divf %91, %92 : vector<1x8x1xf32>
    %94 = vector.broadcast %86 : vector<1x8x1xf32> to vector<1x8x32xf32>
    %95 = arith.subf %82, %94 : vector<1x8x32xf32>
    %cst_30 = arith.constant 9.99999974E-6 : f32
    %96 = vector.broadcast %cst_30 : f32 to vector<1x8x1xf32>
    %97 = arith.addf %93, %96 : vector<1x8x1xf32>
    %98 = math.rsqrt %97 : vector<1x8x1xf32>
    %99 = vector.broadcast %98 : vector<1x8x1xf32> to vector<1x8x32xf32>
    %100 = arith.mulf %95, %99 : vector<1x8x32xf32>
    %101 = vector.shape_cast %12 : vector<1x32xf32> to vector<1x1x32xf32>
    %102 = vector.broadcast %101 : vector<1x1x32xf32> to vector<1x8x32xf32>
    %103 = arith.mulf %100, %102 : vector<1x8x32xf32>
    %104 = vector.shape_cast %13 : vector<1x32xf32> to vector<1x1x32xf32>
    %105 = vector.broadcast %104 : vector<1x1x32xf32> to vector<1x8x32xf32>
    %106 = arith.addf %103, %105 : vector<1x8x32xf32>
    %107 = arith.addf %1, %106 : vector<1x8x32xf32>
    %cst_31 = arith.constant dense<0.000000e+00> : vector<1x8xf32>
    %108 = vector.multi_reduction <add>, %107, %cst_31 [2] : vector<1x8x32xf32> to vector<1x8xf32>
    %109 = vector.shape_cast %108 : vector<1x8xf32> to vector<1x8x1xf32>
    %cst_32 = arith.constant 3.200000e+01 : f32
    %110 = vector.broadcast %cst_32 : f32 to vector<1x8x1xf32>
    %111 = arith.divf %109, %110 : vector<1x8x1xf32>
    %112 = vector.broadcast %111 : vector<1x8x1xf32> to vector<1x8x32xf32>
    %113 = arith.subf %107, %112 : vector<1x8x32xf32>
    %114 = arith.mulf %113, %113 : vector<1x8x32xf32>
    %cst_33 = arith.constant dense<0.000000e+00> : vector<1x8xf32>
    %115 = vector.multi_reduction <add>, %114, %cst_33 [2] : vector<1x8x32xf32> to vector<1x8xf32>
    %116 = vector.shape_cast %115 : vector<1x8xf32> to vector<1x8x1xf32>
    %cst_34 = arith.constant 3.200000e+01 : f32
    %117 = vector.broadcast %cst_34 : f32 to vector<1x8x1xf32>
    %118 = arith.divf %116, %117 : vector<1x8x1xf32>
    %119 = vector.broadcast %111 : vector<1x8x1xf32> to vector<1x8x32xf32>
    %120 = arith.subf %107, %119 : vector<1x8x32xf32>
    %cst_35 = arith.constant 9.99999974E-6 : f32
    %121 = vector.broadcast %cst_35 : f32 to vector<1x8x1xf32>
    %122 = arith.addf %118, %121 : vector<1x8x1xf32>
    %123 = math.rsqrt %122 : vector<1x8x1xf32>
    %124 = vector.broadcast %123 : vector<1x8x1xf32> to vector<1x8x32xf32>
    %125 = arith.mulf %120, %124 : vector<1x8x32xf32>
    %126 = vector.shape_cast %14 : vector<1x32xf32> to vector<1x1x32xf32>
    %127 = vector.broadcast %126 : vector<1x1x32xf32> to vector<1x8x32xf32>
    %128 = arith.mulf %125, %127 : vector<1x8x32xf32>
    %129 = vector.shape_cast %15 : vector<1x32xf32> to vector<1x1x32xf32>
    %130 = vector.broadcast %129 : vector<1x1x32xf32> to vector<1x8x32xf32>
    %131 = arith.addf %128, %130 : vector<1x8x32xf32>
    %c1 = arith.constant 1 : index
    %c0_36 = arith.constant 0 : index
    %c0_37 = arith.constant 0 : index
    %132 = vector.load %arg3[%c1, %c0_36, %c0_37] : memref<2x32x96xbf16, #tpu.memory_space<vmem>>, vector<1x32x96xbf16>
    %133 = vector.shape_cast %132 : vector<1x32x96xbf16> to vector<32x96xbf16>
    %c1_38 = arith.constant 1 : index
    %c0_39 = arith.constant 0 : index
    %c0_40 = arith.constant 0 : index
    %134 = vector.load %arg4[%c1_38, %c0_39, %c0_40] : memref<2x1x96xf32, #tpu.memory_space<vmem>>, vector<1x1x96xf32>
    %135 = vector.shape_cast %134 : vector<1x1x96xf32> to vector<1x96xf32>
    %c1_41 = arith.constant 1 : index
    %c0_42 = arith.constant 0 : index
    %c0_43 = arith.constant 0 : index
    %136 = vector.load %arg5[%c1_41, %c0_42, %c0_43] : memref<2x32x32xbf16, #tpu.memory_space<vmem>>, vector<1x32x32xbf16>
    %137 = vector.shape_cast %136 : vector<1x32x32xbf16> to vector<32x32xbf16>
    %c1_44 = arith.constant 1 : index
    %c0_45 = arith.constant 0 : index
    %c0_46 = arith.constant 0 : index
    %138 = vector.load %arg6[%c1_44, %c0_45, %c0_46] : memref<2x1x32xf32, #tpu.memory_space<vmem>>, vector<1x1x32xf32>
    %139 = vector.shape_cast %138 : vector<1x1x32xf32> to vector<1x32xf32>
    %c1_47 = arith.constant 1 : index
    %c0_48 = arith.constant 0 : index
    %c0_49 = arith.constant 0 : index
    %140 = vector.load %arg7[%c1_47, %c0_48, %c0_49] : memref<2x4x32xf32, #tpu.memory_space<vmem>>, vector<1x4x32xf32>
    %141 = vector.shape_cast %140 : vector<1x4x32xf32> to vector<4x32xf32>
    %142 = vector.extract_strided_slice %141 {offsets = [0, 0], sizes = [1, 32], strides = [1, 1]} : vector<4x32xf32> to vector<1x32xf32>
    %143 = vector.extract_strided_slice %141 {offsets = [1, 0], sizes = [1, 32], strides = [1, 1]} : vector<4x32xf32> to vector<1x32xf32>
    %144 = vector.extract_strided_slice %141 {offsets = [2, 0], sizes = [1, 32], strides = [1, 1]} : vector<4x32xf32> to vector<1x32xf32>
    %145 = vector.extract_strided_slice %141 {offsets = [3, 0], sizes = [1, 32], strides = [1, 1]} : vector<4x32xf32> to vector<1x32xf32>
    %146 = vector.shape_cast %131 : vector<1x8x32xf32> to vector<8x32xf32>
    %147 = arith.truncf %146 : vector<8x32xf32> to vector<8x32xbf16>
    %cst_50 = arith.constant dense<0.000000e+00> : vector<8x96xf32>
    %148 = tpu.matmul %147, %133, %cst_50 {dimension_numbers = #tpu.dot_dimension_numbers<[1], [0], [0], [1], [0, 0, 1, 1], [], []>} : vector<8x32xbf16>, vector<32x96xbf16>, vector<8x96xf32> -> vector<8x96xf32>
    %149 = vector.broadcast %135 : vector<1x96xf32> to vector<8x96xf32>
    %150 = arith.addf %148, %149 : vector<8x96xf32>
    %151 = vector.extract_strided_slice %150 {offsets = [0, 0], sizes = [8, 8], strides = [1, 1]} : vector<8x96xf32> to vector<8x8xf32>
    %152 = vector.shape_cast %151 : vector<8x8xf32> to vector<1x8x8xf32>
    %153 = vector.extract_strided_slice %150 {offsets = [0, 8], sizes = [8, 8], strides = [1, 1]} : vector<8x96xf32> to vector<8x8xf32>
    %154 = vector.shape_cast %153 : vector<8x8xf32> to vector<1x8x8xf32>
    %155 = vector.extract_strided_slice %150 {offsets = [0, 16], sizes = [8, 8], strides = [1, 1]} : vector<8x96xf32> to vector<8x8xf32>
    %156 = vector.shape_cast %155 : vector<8x8xf32> to vector<1x8x8xf32>
    %157 = vector.extract_strided_slice %150 {offsets = [0, 24], sizes = [8, 8], strides = [1, 1]} : vector<8x96xf32> to vector<8x8xf32>
    %158 = vector.shape_cast %157 : vector<8x8xf32> to vector<1x8x8xf32>
    %159 = tpu.concatenate %152, %154, %156, %158 in 0 : vector<1x8x8xf32>, vector<1x8x8xf32>, vector<1x8x8xf32>, vector<1x8x8xf32> -> vector<4x8x8xf32>
    %160 = vector.extract_strided_slice %150 {offsets = [0, 32], sizes = [8, 8], strides = [1, 1]} : vector<8x96xf32> to vector<8x8xf32>
    %161 = vector.shape_cast %160 : vector<8x8xf32> to vector<1x8x8xf32>
    %162 = vector.extract_strided_slice %150 {offsets = [0, 40], sizes = [8, 8], strides = [1, 1]} : vector<8x96xf32> to vector<8x8xf32>
    %163 = vector.shape_cast %162 : vector<8x8xf32> to vector<1x8x8xf32>
    %164 = vector.extract_strided_slice %150 {offsets = [0, 48], sizes = [8, 8], strides = [1, 1]} : vector<8x96xf32> to vector<8x8xf32>
    %165 = vector.shape_cast %164 : vector<8x8xf32> to vector<1x8x8xf32>
    %166 = vector.extract_strided_slice %150 {offsets = [0, 56], sizes = [8, 8], strides = [1, 1]} : vector<8x96xf32> to vector<8x8xf32>
    %167 = vector.shape_cast %166 : vector<8x8xf32> to vector<1x8x8xf32>
    %168 = tpu.concatenate %161, %163, %165, %167 in 0 : vector<1x8x8xf32>, vector<1x8x8xf32>, vector<1x8x8xf32>, vector<1x8x8xf32> -> vector<4x8x8xf32>
    %169 = vector.extract_strided_slice %150 {offsets = [0, 64], sizes = [8, 8], strides = [1, 1]} : vector<8x96xf32> to vector<8x8xf32>
    %170 = vector.shape_cast %169 : vector<8x8xf32> to vector<1x8x8xf32>
    %171 = vector.extract_strided_slice %150 {offsets = [0, 72], sizes = [8, 8], strides = [1, 1]} : vector<8x96xf32> to vector<8x8xf32>
    %172 = vector.shape_cast %171 : vector<8x8xf32> to vector<1x8x8xf32>
    %173 = vector.extract_strided_slice %150 {offsets = [0, 80], sizes = [8, 8], strides = [1, 1]} : vector<8x96xf32> to vector<8x8xf32>
    %174 = vector.shape_cast %173 : vector<8x8xf32> to vector<1x8x8xf32>
    %175 = vector.extract_strided_slice %150 {offsets = [0, 88], sizes = [8, 8], strides = [1, 1]} : vector<8x96xf32> to vector<8x8xf32>
    %176 = vector.shape_cast %175 : vector<8x8xf32> to vector<1x8x8xf32>
    %177 = tpu.concatenate %170, %172, %174, %176 in 0 : vector<1x8x8xf32>, vector<1x8x8xf32>, vector<1x8x8xf32>, vector<1x8x8xf32> -> vector<4x8x8xf32>
    %178 = arith.truncf %159 : vector<4x8x8xf32> to vector<4x8x8xbf16>
    %179 = arith.truncf %168 : vector<4x8x8xf32> to vector<4x8x8xbf16>
    "tpu.trace_start"() <{level = 10 : i32, message = "nqd,nkd->nqk"}> : () -> ()
    %cst_51 = arith.constant dense<0.000000e+00> : vector<4x8x8xf32>
    %180 = tpu.matmul %178, %179, %cst_51 {dimension_numbers = #tpu.dot_dimension_numbers<[2], [2], [1], [1], [0, 0, 0, 1, 1, 1], [0], [0]>} : vector<4x8x8xbf16>, vector<4x8x8xbf16>, vector<4x8x8xf32> -> vector<4x8x8xf32>
    "tpu.trace_stop"() : () -> ()
    %cst_52 = arith.constant 0.353553385 : f32
    %181 = vector.broadcast %cst_52 : f32 to vector<4x8x8xf32>
    %182 = arith.mulf %180, %181 : vector<4x8x8xf32>
    %183 = vector.broadcast %0 : vector<1x1x8xf32> to vector<4x8x8xf32>
    %184 = arith.addf %182, %183 : vector<4x8x8xf32>
    %cst_53 = arith.constant dense<0xFF800000> : vector<4x8xf32>
    %185 = vector.multi_reduction <maximumf>, %184, %cst_53 [2] : vector<4x8x8xf32> to vector<4x8xf32>
    %186 = vector.shape_cast %185 : vector<4x8xf32> to vector<4x8x1xf32>
    %187 = vector.broadcast %186 : vector<4x8x1xf32> to vector<4x8x8xf32>
    %188 = arith.subf %184, %187 : vector<4x8x8xf32>
    %189 = math.exp %188 : vector<4x8x8xf32>
    %cst_54 = arith.constant dense<0.000000e+00> : vector<4x8xf32>
    %190 = vector.multi_reduction <add>, %189, %cst_54 [2] : vector<4x8x8xf32> to vector<4x8xf32>
    %191 = vector.shape_cast %190 : vector<4x8xf32> to vector<4x8x1xf32>
    %192 = tpu.reciprocal %191 {approx = true} : vector<4x8x1xf32> -> vector<4x8x1xf32>
    %193 = vector.broadcast %192 : vector<4x8x1xf32> to vector<4x8x8xf32>
    %194 = arith.mulf %189, %193 : vector<4x8x8xf32>
    %195 = arith.truncf %194 : vector<4x8x8xf32> to vector<4x8x8xbf16>
    %196 = arith.truncf %177 : vector<4x8x8xf32> to vector<4x8x8xbf16>
    "tpu.trace_start"() <{level = 10 : i32, message = "nqk,nkd->nqd"}> : () -> ()
    %cst_55 = arith.constant dense<0.000000e+00> : vector<4x8x8xf32>
    %197 = tpu.matmul %195, %196, %cst_55 {dimension_numbers = #tpu.dot_dimension_numbers<[2], [1], [1], [2], [0, 0, 0, 1, 1, 2], [0], [0]>} : vector<4x8x8xbf16>, vector<4x8x8xbf16>, vector<4x8x8xf32> -> vector<4x8x8xf32>
    "tpu.trace_stop"() : () -> ()
    %198 = vector.extract_strided_slice %197 {offsets = [0, 0, 0], sizes = [1, 8, 8], strides = [1, 1, 1]} : vector<4x8x8xf32> to vector<1x8x8xf32>
    %199 = vector.shape_cast %198 : vector<1x8x8xf32> to vector<8x8xf32>
    %200 = vector.extract_strided_slice %197 {offsets = [1, 0, 0], sizes = [1, 8, 8], strides = [1, 1, 1]} : vector<4x8x8xf32> to vector<1x8x8xf32>
    %201 = vector.shape_cast %200 : vector<1x8x8xf32> to vector<8x8xf32>
    %202 = vector.extract_strided_slice %197 {offsets = [2, 0, 0], sizes = [1, 8, 8], strides = [1, 1, 1]} : vector<4x8x8xf32> to vector<1x8x8xf32>
    %203 = vector.shape_cast %202 : vector<1x8x8xf32> to vector<8x8xf32>
    %204 = vector.extract_strided_slice %197 {offsets = [3, 0, 0], sizes = [1, 8, 8], strides = [1, 1, 1]} : vector<4x8x8xf32> to vector<1x8x8xf32>
    %205 = vector.shape_cast %204 : vector<1x8x8xf32> to vector<8x8xf32>
    %206 = tpu.concatenate %199, %201, %203, %205 in 1 : vector<8x8xf32>, vector<8x8xf32>, vector<8x8xf32>, vector<8x8xf32> -> vector<8x32xf32>
    %207 = arith.truncf %206 : vector<8x32xf32> to vector<8x32xbf16>
    %cst_56 = arith.constant dense<0.000000e+00> : vector<8x32xf32>
    %208 = tpu.matmul %207, %137, %cst_56 {dimension_numbers = #tpu.dot_dimension_numbers<[1], [0], [0], [1], [0, 0, 1, 1], [], []>} : vector<8x32xbf16>, vector<32x32xbf16>, vector<8x32xf32> -> vector<8x32xf32>
    %209 = vector.broadcast %139 : vector<1x32xf32> to vector<8x32xf32>
    %210 = arith.addf %208, %209 : vector<8x32xf32>
    %211 = vector.shape_cast %210 : vector<8x32xf32> to vector<1x8x32xf32>
    %212 = arith.addf %131, %211 : vector<1x8x32xf32>
    %cst_57 = arith.constant dense<0.000000e+00> : vector<1x8xf32>
    %213 = vector.multi_reduction <add>, %212, %cst_57 [2] : vector<1x8x32xf32> to vector<1x8xf32>
    %214 = vector.shape_cast %213 : vector<1x8xf32> to vector<1x8x1xf32>
    %cst_58 = arith.constant 3.200000e+01 : f32
    %215 = vector.broadcast %cst_58 : f32 to vector<1x8x1xf32>
    %216 = arith.divf %214, %215 : vector<1x8x1xf32>
    %217 = vector.broadcast %216 : vector<1x8x1xf32> to vector<1x8x32xf32>
    %218 = arith.subf %212, %217 : vector<1x8x32xf32>
    %219 = arith.mulf %218, %218 : vector<1x8x32xf32>
    %cst_59 = arith.constant dense<0.000000e+00> : vector<1x8xf32>
    %220 = vector.multi_reduction <add>, %219, %cst_59 [2] : vector<1x8x32xf32> to vector<1x8xf32>
    %221 = vector.shape_cast %220 : vector<1x8xf32> to vector<1x8x1xf32>
    %cst_60 = arith.constant 3.200000e+01 : f32
    %222 = vector.broadcast %cst_60 : f32 to vector<1x8x1xf32>
    %223 = arith.divf %221, %222 : vector<1x8x1xf32>
    %224 = vector.broadcast %216 : vector<1x8x1xf32> to vector<1x8x32xf32>
    %225 = arith.subf %212, %224 : vector<1x8x32xf32>
    %cst_61 = arith.constant 9.99999974E-6 : f32
    %226 = vector.broadcast %cst_61 : f32 to vector<1x8x1xf32>
    %227 = arith.addf %223, %226 : vector<1x8x1xf32>
    %228 = math.rsqrt %227 : vector<1x8x1xf32>
    %229 = vector.broadcast %228 : vector<1x8x1xf32> to vector<1x8x32xf32>
    %230 = arith.mulf %225, %229 : vector<1x8x32xf32>
    %231 = vector.shape_cast %142 : vector<1x32xf32> to vector<1x1x32xf32>
    %232 = vector.broadcast %231 : vector<1x1x32xf32> to vector<1x8x32xf32>
    %233 = arith.mulf %230, %232 : vector<1x8x32xf32>
    %234 = vector.shape_cast %143 : vector<1x32xf32> to vector<1x1x32xf32>
    %235 = vector.broadcast %234 : vector<1x1x32xf32> to vector<1x8x32xf32>
    %236 = arith.addf %233, %235 : vector<1x8x32xf32>
    %237 = arith.addf %131, %236 : vector<1x8x32xf32>
    %cst_62 = arith.constant dense<0.000000e+00> : vector<1x8xf32>
    %238 = vector.multi_reduction <add>, %237, %cst_62 [2] : vector<1x8x32xf32> to vector<1x8xf32>
    %239 = vector.shape_cast %238 : vector<1x8xf32> to vector<1x8x1xf32>
    %cst_63 = arith.constant 3.200000e+01 : f32
    %240 = vector.broadcast %cst_63 : f32 to vector<1x8x1xf32>
    %241 = arith.divf %239, %240 : vector<1x8x1xf32>
    %242 = vector.broadcast %241 : vector<1x8x1xf32> to vector<1x8x32xf32>
    %243 = arith.subf %237, %242 : vector<1x8x32xf32>
    %244 = arith.mulf %243, %243 : vector<1x8x32xf32>
    %cst_64 = arith.constant dense<0.000000e+00> : vector<1x8xf32>
    %245 = vector.multi_reduction <add>, %244, %cst_64 [2] : vector<1x8x32xf32> to vector<1x8xf32>
    %246 = vector.shape_cast %245 : vector<1x8xf32> to vector<1x8x1xf32>
    %cst_65 = arith.constant 3.200000e+01 : f32
    %247 = vector.broadcast %cst_65 : f32 to vector<1x8x1xf32>
    %248 = arith.divf %246, %247 : vector<1x8x1xf32>
    %249 = vector.broadcast %241 : vector<1x8x1xf32> to vector<1x8x32xf32>
    %250 = arith.subf %237, %249 : vector<1x8x32xf32>
    %cst_66 = arith.constant 9.99999974E-6 : f32
    %251 = vector.broadcast %cst_66 : f32 to vector<1x8x1xf32>
    %252 = arith.addf %248, %251 : vector<1x8x1xf32>
    %253 = math.rsqrt %252 : vector<1x8x1xf32>
    %254 = vector.broadcast %253 : vector<1x8x1xf32> to vector<1x8x32xf32>
    %255 = arith.mulf %250, %254 : vector<1x8x32xf32>
    %256 = vector.shape_cast %144 : vector<1x32xf32> to vector<1x1x32xf32>
    %257 = vector.broadcast %256 : vector<1x1x32xf32> to vector<1x8x32xf32>
    %258 = arith.mulf %255, %257 : vector<1x8x32xf32>
    %259 = vector.shape_cast %145 : vector<1x32xf32> to vector<1x1x32xf32>
    %260 = vector.broadcast %259 : vector<1x1x32xf32> to vector<1x8x32xf32>
    %261 = arith.addf %258, %260 : vector<1x8x32xf32>
    %c0_67 = arith.constant 0 : index
    %c0_68 = arith.constant 0 : index
    %c0_69 = arith.constant 0 : index
    %262 = vector.load %arg8[%c0_67, %c0_68, %c0_69] : memref<1x8x32xf32, #tpu.memory_space<vmem>>, vector<1x8x32xf32>
    tpu.vector_store %arg8[%c0_67, %c0_68, %c0_69], %261 {strides = array<i32>} : memref<1x8x32xf32, #tpu.memory_space<vmem>>, vector<1x8x32xf32>,
    return
  }
  func.func @transform_0(%arg0: i32) -> (i32, i32, i32) {
    %c0_i32 = arith.constant 0 : i32
    %c0_i32_0 = arith.constant 0 : i32
    %c0_i32_1 = arith.constant 0 : i32
    return %arg0, %c0_i32, %c0_i32_0 : i32, i32, i32
  }
  func.func @transform_1(%arg0: i32) -> (i32, i32, i32) {
    %c0_i32 = arith.constant 0 : i32
    %c0_i32_0 = arith.constant 0 : i32
    %c0_i32_1 = arith.constant 0 : i32
    return %arg0, %c0_i32, %c0_i32_0 : i32, i32, i32
  }
  func.func @transform_2(%arg0: i32) -> (i32, i32, i32) {
    %c0_i32 = arith.constant 0 : i32
    %c0_i32_0 = arith.constant 0 : i32
    %c0_i32_1 = arith.constant 0 : i32
    %c0_i32_2 = arith.constant 0 : i32
    return %c0_i32, %c0_i32_0, %c0_i32_1 : i32, i32, i32
  }
  func.func @transform_3(%arg0: i32) -> (i32, i32, i32) {
    %c0_i32 = arith.constant 0 : i32
    %c0_i32_0 = arith.constant 0 : i32
    %c0_i32_1 = arith.constant 0 : i32
    %c0_i32_2 = arith.constant 0 : i32
    return %c0_i32, %c0_i32_0, %c0_i32_1 : i32, i32, i32
  }
  func.func @transform_4(%arg0: i32) -> (i32, i32, i32) {
    %c0_i32 = arith.constant 0 : i32
    %c0_i32_0 = arith.constant 0 : i32
    %c0_i32_1 = arith.constant 0 : i32
    %c0_i32_2 = arith.constant 0 : i32
    return %c0_i32, %c0_i32_0, %c0_i32_1 : i32, i32, i32
  }
  func.func @transform_5(%arg0: i32) -> (i32, i32, i32) {
    %c0_i32 = arith.constant 0 : i32
    %c0_i32_0 = arith.constant 0 : i32
    %c0_i32_1 = arith.constant 0 : i32
    %c0_i32_2 = arith.constant 0 : i32
    return %c0_i32, %c0_i32_0, %c0_i32_1 : i32, i32, i32
  }
  func.func @transform_6(%arg0: i32) -> (i32, i32, i32) {
    %c0_i32 = arith.constant 0 : i32
    %c0_i32_0 = arith.constant 0 : i32
    %c0_i32_1 = arith.constant 0 : i32
    %c0_i32_2 = arith.constant 0 : i32
    return %c0_i32, %c0_i32_0, %c0_i32_1 : i32, i32, i32
  }
  func.func @transform_7(%arg0: i32) -> (i32, i32, i32) {
    %c0_i32 = arith.constant 0 : i32
    %c0_i32_0 = arith.constant 0 : i32
    %c0_i32_1 = arith.constant 0 : i32
    return %arg0, %c0_i32, %c0_i32_0 : i32, i32, i32
  }
}

</mosaic_0001>

<bundles_post_ra>
// kernel: tpu_custom_call.1
= control target key start
LH: loop header
LB: loop body
LE: loop exit
PB: predicated region body
PF: predicated region fallthrough
CT: control target
= control target key end

     0   :  { %s2959_s0 = inlined_call_operand.hbm [shape: f32[2,1,8], index: 0, kind: input, shape index: {}]   ;;  %s2960_s1 = inlined_call_operand.hbm [shape: f32[2,8,32], index: 1, kind: input, shape index: {}]   ;;  %s2961_s2 = inlined_call_operand.hbm [shape: bf16[2,32,96], index: 2, kind: input, shape index: {}]   ;;  %s2962_s3 = inlined_call_operand.vmem [shape: f32[2,1,96], index: 3, kind: input, shape index: {}]   ;;  %s2963_s4 = inlined_call_operand.hbm [shape: bf16[2,32,32], index: 4, kind: input, shape index: {}]   ;;  %s2964_s5 = inlined_call_operand.vmem [shape: f32[2,1,32], index: 5, kind: input, shape index: {}]   ;;  %s2965_s6 = inlined_call_operand.vmem [shape: f32[2,4,32], index: 6, kind: input, shape index: {}]   ;;  %s2966_s7 = inlined_call_operand.hbm [shape: f32[2,8,32], index: 7, kind: output, shape index: {}]  }
   0x1   :  { %2971 = sst [smem:[#allocation16_spill]] %s2959_s0 }
   0x2   :  { %2972 = sst [smem:[#allocation17_spill]] %s2961_s2 }
   0x3   :  { %2973 = sst [smem:[#allocation18_spill]] %s2963_s4 }
   0x4   :  { %12 = vsyncpa [#allocation3], 0 }
   0x5   :  { %14 = vsyncpa [#allocation3 + $0x1], 0 }
   0x6   :  { %15 = vsyncpa [#allocation6], 0 }
   0x7   :  { %17 = vsyncpa [#allocation6 + $0x1], 0 }
   0x8   :  { %18 = vsyncpa [#allocation9], 0 }
   0x9   :  { %19 = vsyncpa [#allocation4], 0 }
   0xa   :  { %21 = vsyncpa [#allocation4 + $0x1], 0  ;;  %s2423_s24 = smov 0   ;;  %s2425_s25 = smov 0  }
   0xb   :  { %s2427_s26 = smov 0   ;;  %s2429_s27 = smov 0  }
   0xc LB: > { %s2444_s28 = sadd.s32 4294967295, %s2364_s27   ;;  %s1813_s29 = sadd.s32 4294967294, %s2364_s27   ;;  %s2364_s27 = sphi %s2429_s27, %s2997_s27   ;;  %s2360_s26 = sphi %s2427_s26, %s2996_s26   ;;  %s2356_s25 = sphi %s2425_s25, %s2995_s25   ;;  %s2352_s24 = sphi %s2423_s24, %s2994_s24  }
   0xd   : > { %p47_p0 = scmp.ne.s32.totalorder %s2356_s25, %s2352_s24  ;;  %p2967_p1 = scmp.eq.s32.totalorder %s2444_s28, 0 }
   0xe   : > { %p208_p3 = scmp.eq.s32.totalorder %s1813_s29, 1  ;;  %p1814_p5 = scmp.ge.s32.totalorder %s2364_s27, 1 }
   0xf   : > { %p2453_p4 = por %p2967_p1, %p47_p0  ;;  %p215_p7 = scmp.lt.s32.totalorder %s2364_s27, 3 }
  0x10   : > { %p2458_p6 = por %p208_p3, %p47_p0  ;;  %s2366_s10 = smov [#allocation7]  }
  0x11   : > { %s2974_s30 = scalar_select %p2453_p4, 1, 0 }
  0x12   : > { %s2975_s8 = scalar_select %p2458_p6, 1, 0 }
  0x13   : > { %p2463_p8 = pnand %p1814_p5, %p215_p7  ;;  %s227_s11 = sshll.u32 %s2366_s10, 4  ;;  %s2467_s11 = int_to_ptr.vmem [resolvable:$true] %s227_s11 }
  0x14   : > { %s2367_s13 = smov [#allocation8]   ;;  %s2978_s2 = sld [smem:[#allocation17_spill]] }
  0x15   : > { %s2976_s9 = scalar_select %p2463_p8, 1, 0 }
  0x16   : > { %p2052_p9 = pneg %p2463_p8  ;;  %s243_s14 = sshll.u32 %s2367_s13, 4  ;;  %s2478_s14 = int_to_ptr.vmem [resolvable:$true] %s243_s14 }
  0x18   : > { %p2474_p11 = pnand %p2052_p9, %p2967_p1 }
  0x1a   : > { %s2170_s17 = scalar_lea.hbm %s2978_s2, 512  ;;  %p2172_p13 = pneg %p2474_p11 }
  0x1b   : > { %p2171_p12 = scmp.ne.s32.totalorder %s2978_s2, %s2170_s17  ;;  %p2177_p5 = scmp.lt.u32.totalorder %s2170_s17, %s2978_s2 }
  0x1d   : > { %p2173_p0 = pnand %p2172_p13, %p2171_p12 }
  0x1f   : > { %p2174_p3 = pneg %p2173_p0 }
  0x21   : > { %p2179_p7 = pnand %p2177_p5, %p2174_p3 }
  0x23   : > { %2182 = shalt.err (!%p2179_p7)
}
  0x24   : > { %s2183_s22 = scalar_lea.vmem %s2467_s11, 512  ;;  %p2191_p2 = scmp.lt.s32.totalorder %s2467_s11, %s2467_s11 }
  0x25   : > { %p2184_p9 = scmp.ne.s32.totalorder %s2467_s11, %s2183_s22  ;;  %p2192_p12 = scmp.lt.s32.totalorder %s2183_s22, %s2183_s22 }
  0x27   : > { %p2186_p10 = pnand %p2184_p9, %p2172_p13  ;;  %p2193_p0 = por %p2192_p12, %p2191_p2 }
  0x29   : > { %p2187_p1 = pneg %p2186_p10 }
  0x2b   : > { %p2194_p6 = pnand %p2193_p0, %p2187_p1 }
  0x2d   : > { %2197 = shalt.err (!%p2194_p6)
}
  0x2e   : > { %s2368_s23 = smov 64   ;;  %s2369_s29 = smov 4  }
  0x2f   : > { %2055 = dma.hbm_to_vmem [thread:$0]  (!%p2474_p11), %s2978_s2, 512, %s2467_s11, [#allocation6], %s2368_s23, %s2368_s23, %s2369_s29  }
  0x30   : > { %s2979_s4 = sld [smem:[#allocation18_spill]] }
  0x36   : > { %s2198_s17 = scalar_lea.hbm %s2979_s4, 512 }
  0x37   : > { %p2199_p2 = scmp.ne.s32.totalorder %s2979_s4, %s2198_s17  ;;  %p2205_p10 = scmp.lt.u32.totalorder %s2198_s17, %s2979_s4 }
  0x39   : > { %p2201_p1 = pnand %p2199_p2, %p2172_p13 }
  0x3b   : > { %p2202_p6 = pneg %p2201_p1 }
  0x3d   : > { %p2207_p3 = pnand %p2205_p10, %p2202_p6 }
  0x3f   : > { %2210 = shalt.err (!%p2207_p3)
}
  0x40   : > { %s2211_s11 = scalar_lea.vmem %s2478_s14, 512  ;;  %p2219_p12 = scmp.lt.s32.totalorder %s2478_s14, %s2478_s14 }
  0x41   : > { %p2212_p5 = scmp.ne.s32.totalorder %s2478_s14, %s2211_s11  ;;  %p2220_p0 = scmp.lt.s32.totalorder %s2211_s11, %s2211_s11 }
  0x43   : > { %p2214_p7 = pnand %p2212_p5, %p2172_p13  ;;  %p2221_p2 = por %p2220_p0, %p2219_p12 }
  0x45   : > { %p2215_p9 = pneg %p2214_p7 }
  0x47   : > { %p2222_p1 = pnand %p2221_p2, %p2215_p9 }
  0x49   : > { %2225 = shalt.err (!%p2222_p1)
}
  0x4a   : > { %2058 = dma.hbm_to_vmem [thread:$0]  (!%p2474_p11), %s2979_s4, 512, %s2478_s14, [#allocation9], %s2368_s23, %s2368_s23, %s2369_s29  }
  0x4b   : > { %s2533_s13 = sadd.s32 1, %s2364_s27   ;;  %s34_s12 = sadd.s32 1, %s2360_s26 }
  0x4c   : > { %s31_s15 = ssub.s32 %s2364_s27, %s2533_s13  ;;  %p41_p13 = scmp.ne.s32.totalorder %s2360_s26, %s2356_s25 }
  0x4d   : > { %p32_p6 = scmp.eq.s32.totalorder %s31_s15, 0  ;;  %p42_p10 = scmp.eq.s32.totalorder %s2364_s27, 0 }
  0x4e   : > { %p2980_p3 = scmp.eq.s32.totalorder %s2444_s28, 1  ;;  %p2072_p7 = scmp.lt.s32.totalorder %s2364_s27, 2 }
  0x4f   : > { %s2549_s17 = scalar_select %p32_p6, %s2360_s26, %s34_s12  }
  0x50   : > { %p2543_p5 = por %p2980_p3, %p41_p13  ;;  %p43_p9 = por %p42_p10, %p41_p13 }
  0x51   : > { %s2552_s18 = sand.u32 1, %s2360_s26   ;;  %s1818_s14 = sshll.u32 %s2364_s27, 4 }
  0x52   : > { %s2981_s16 = scalar_select %p2543_p5, 1, 0 }
  0x53   : > { %s266_s23 = scalar_lea.vmem [#allocation2], %s2552_s18  ;;  %s2982_s0 = sld [smem:[#allocation16_spill]] }
  0x54   : > { %s273_s29 = sshll.u32 %s266_s23, 4  ;;  %p2563_p11 = pnand %p2072_p7, %p43_p9  ;;  %s2561_s29 = int_to_ptr.vmem [resolvable:$true] %s273_s29 }
  0x55   : > { %s1819_s10 = sshll.u32 %s2552_s18, 3  ;;  %s264_s12 = scalar_lea.sflag [#allocation3], %s2552_s18 }
  0x56   : > { %p2228_p0 = pneg %p2563_p11 }
  0x59   : > { %s2559_s21 = scalar_lea.hbm %s2982_s0, %s1818_s14  ;;  %s2231_s19 = scalar_lea.hbm %s2982_s0, 32 }
  0x5a   : > { %s2226_s15 = scalar_lea.hbm %s2559_s21, 16  ;;  %p2232_p13 = scmp.lt.u32.totalorder %s2559_s21, %s2982_s0 }
  0x5b   : > { %p2227_p12 = scmp.ne.s32.totalorder %s2559_s21, %s2226_s15  ;;  %p2233_p6 = scmp.lt.u32.totalorder %s2231_s19, %s2226_s15 }
  0x5c   : > { %p2235_p3 = scmp.lt.u32.totalorder %s2226_s15, %s2559_s21 }
  0x5d   : > { %p2229_p2 = pnand %p2228_p0, %p2227_p12  ;;  %p2234_p10 = por %p2233_p6, %p2232_p13 }
  0x5f   : > { %p2230_p1 = pneg %p2229_p2  ;;  %p2236_p7 = por %p2235_p3, %p2234_p10 }
  0x61   : > { %p2237_p9 = pnand %p2236_p7, %p2230_p1 }
  0x63   : > { %2240 = shalt.err (!%p2237_p9)
}
  0x64   : > { %s2241_s22 = scalar_lea.vmem %s2561_s29, 16  ;;  %s2370_s14 = smov [#allocation2]  }
  0x65   : > { %p2242_p12 = scmp.ne.s32.totalorder %s2561_s29, %s2241_s22  ;;  %s2246_s23 = sshll.u32 %s2370_s14, 4  ;;  %s2247_s23 = int_to_ptr.vmem [resolvable:$false] %s2246_s23 }
  0x66   : > { %s2248_s2 = scalar_lea.vmem %s2247_s23, 32  ;;  %p2249_p4 = scmp.lt.s32.totalorder %s2561_s29, %s2247_s23 }
  0x67   : > { %p2244_p2 = pnand %p2242_p12, %p2228_p0  ;;  %p2250_p13 = scmp.lt.s32.totalorder %s2248_s2, %s2241_s22 }
  0x69   : > { %p2245_p5 = pneg %p2244_p2  ;;  %p2251_p6 = por %p2250_p13, %p2249_p4 }
  0x6b   : > { %p2252_p10 = pnand %p2251_p6, %p2245_p5 }
  0x6d   : > { %2255 = shalt.err (!%p2252_p10)
}
  0x6e   : > { %2062 = dma.hbm_to_vmem [thread:$0]  (!%p2563_p11), %s2559_s21, 16, %s2561_s29, %s264_s12  }
  0x6f   : > { %s1820_s15 = sshll.u32 %s2364_s27, 7  ;;  %s284_s19 = scalar_lea.vmem [#allocation5], %s1819_s10 }
  0x70   : > { %s291_s20 = sshll.u32 %s284_s19, 4  ;;  %s2601_s22 = scalar_lea.hbm %s2960_s1, %s1820_s15  ;;  %s292_s20 = int_to_ptr.vmem [resolvable:$true] %s291_s20 }
  0x71   : > { %s2984_s23 = sand.u32 1, %s2364_s27   ;;  %s2256_s4 = scalar_lea.hbm %s2601_s22, 128 }
  0x72   : > { %s281_s2 = scalar_lea.sflag [#allocation6], %s2984_s23  ;;  %p2257_p4 = scmp.ne.s32.totalorder %s2601_s22, %s2256_s4 }
  0x73   : > { %s2261_s21 = scalar_lea.hbm %s2960_s1, 256  ;;  %p2262_p3 = scmp.lt.u32.totalorder %s2601_s22, %s2960_s1 }
  0x74   : > { %p2259_p5 = pnand %p2257_p4, %p2228_p0  ;;  %p2263_p7 = scmp.lt.u32.totalorder %s2261_s21, %s2256_s4 }
  0x75   : > { %p2265_p12 = scmp.lt.u32.totalorder %s2256_s4, %s2601_s22 }
  0x76   : > { %p2260_p1 = pneg %p2259_p5  ;;  %p2264_p9 = por %p2263_p7, %p2262_p3 }
  0x78   : > { %p2266_p2 = por %p2265_p12, %p2264_p9 }
  0x7a   : > { %p2267_p13 = pnand %p2266_p2, %p2260_p1 }
  0x7c   : > { %2270 = shalt.err (!%p2267_p13)
}
  0x7d   : > { %s2271_s12 = scalar_lea.vmem %s292_s20, 128  ;;  %s2371_s15 = smov [#allocation5]  }
  0x7e   : > { %p2272_p6 = scmp.ne.s32.totalorder %s292_s20, %s2271_s12  ;;  %s2276_s19 = sshll.u32 %s2371_s15, 4  ;;  %s2277_s19 = int_to_ptr.vmem [resolvable:$false] %s2276_s19 }
  0x7f   : > { %s2278_s14 = scalar_lea.vmem %s2277_s19, 256  ;;  %p2279_p5 = scmp.lt.s32.totalorder %s292_s20, %s2277_s19 }
  0x80   : > { %p2274_p10 = pnand %p2272_p6, %p2228_p0  ;;  %p2280_p8 = scmp.lt.s32.totalorder %s2278_s14, %s2271_s12 }
  0x82   : > { %p2275_p4 = pneg %p2274_p10  ;;  %p2281_p3 = por %p2280_p8, %p2279_p5 }
  0x84   : > { %p2282_p7 = pnand %p2281_p3, %p2275_p4 }
  0x86   : > { %2285 = shalt.err (!%p2282_p7)
}
  0x87   : > { %2065 = dma.hbm_to_vmem [thread:$0]  (!%p2563_p11), %s2601_s22, 128, %s292_s20, %s281_s2  }
  0x88   : > { %p2985_p1 = scmp.ne.s32.totalorder %s2976_s9, 0 }
  0x89   : > { %s2627_s4 = sand.u32 (!%p2985_p1), 1, %s2356_s25   ;;  %p2986_p0 = scmp.ne.s32.totalorder (!%p2985_p1), %s2974_s30, 0 }
  0x8a   : > { %300 = sbr.rel (%p2985_p1) target bundleno = 4517 (0x11a5), region = 48  ;;  %s303_s23 = scalar_lea.sflag (!%p2985_p1), [#allocation3], %s2627_s4 }
  0x8b   : > { %s305_s18 = scalar_lea.vmem (!%p2985_p1), [#allocation2], %s2627_s4 }
  0x91   : > { %2331 = dma.done.wait (%p2986_p0), %s303_s23, 16  }
  0x92   : > { %2333 = vsyncadd (%p2986_p0), %s303_s23, 4294967280  ;;  %s310_s11 = sand.u32 1, %s2444_s28   ;;  %s1822_s9 = sshll.u32 %s2627_s4, 3 }
  0x93   : > { %s311_s20 = scalar_lea.sflag [#allocation6], %s310_s11  ;;  %s314_s22 = scalar_lea.vmem [#allocation5], %s1822_s9 }
  0x94   : > { %2335 = dma.done.wait (%p2986_p0), %s311_s20, 128  }
  0x95   : > { %2337 = vsyncadd (%p2986_p0), %s311_s20, 4294967168  ;;  %p2987_p8 = scmp.eq.s32.totalorder %s2444_s28, 0 }
  0x97   : > { %2339 = dma.done.wait (%p2987_p8), [#allocation6], 512   ;;  %p2988_p11 = pmov %p2987_p8 }
  0x98   : > { %p2989_p9 = pmov %p2987_p8 }
  0x99   : > { %2341 = vsyncadd (%p2988_p11), [#allocation6], 4294966784 }
  0x9a   : > { %2343 = dma.done.wait (%p2989_p9), [#allocation9], 512   ;;  %p2990_p12 = pmov %p2987_p8 }
  0x9b   : > { %v2372_v0 = vmov 0.0   ;;  %vm2373_vm0 = vmmov 0   ;;  %v2122_v1 = vld [vmem:[#allocation7] sm:$0xff]   ;;  %v2123_v2 = vld [vmem:[#allocation7 + $0x8] sm:$0xff]   ;;  %v2657_v3 = vld [vmem:[%s314_s22] sm:$0xff]  ;;  %vm390_vm1 = vcmask 261120  }
  0x9c   : > { %2345 = vsyncadd (%p2990_p12), [#allocation9], 4294966784  ;;  %1910 = vmatprep.subr.bf16.mxu0 %v2372_v0  ;;  %1914 = vmatprep.mubr.msk.bf16.mxu0 %vm2373_vm0, %v2372_v0  ;;  %v371_v4 = vpack.c.bf16 %v2657_v3, %v2657_v3  ;;  %v1826_v5 = vld [vmem:[%s2962_s3] ss:$0 sm:$0xff]  ;;  %s2374_s29 = smov 104   ;;  %s2375_s21 = smov 120  }
  0x9d   : > { %1918 = vmatprep.subr.bf16.mxu1 %v2372_v0  ;;  %1920 = vmatprep.mubr.msk.bf16.mxu1 %vm2373_vm0, %v2372_v0  ;;  %s2376_s0 = smov 112   ;;  %s2377_s10 = smov 96   ;;  %vm451_vm2 = vcmask 64512   ;;  %v2714_v27 = vld [vmem:[%s305_s18] ss:$0 sm:$0xff]  ;;  %vm712_vm3 = vcmask 1043456  }
  0x9e   : > { %1911 = vmatpush3.bf16.msra.mxu0 %v2122_v1  ;;  %s2378_s12 = smov 64   ;;  %s2379_s15 = smov 8   ;;  %vm913_vm4 = vcmask 130048   ;;  %vm915_vm5 = vcmask 195584  }
  0x9f   : > { %1912 = vmatprep.subr.bf16.mxu0 %v2372_v0  ;;  %s2380_s19 = smov 16   ;;  %s2381_s14 = smov 24  }
  0xa0   : > { %s1691_s18 = scalar_lea.sflag [#allocation4], %s2627_s4  ;;  %p2991_p13 = scmp.ne.s32.totalorder %s2981_s16, 0 }
  0xa2   : > { %1913 = vmatpush3.bf16.msra.mxu0 %v2123_v2 }
  0xa3   : > { %1924 = vmatprep.subr.bf16.mxu0 %v2372_v0 }
  0xa5   : > { %1915 = vmatmul.mubr.msk.bf16.vlgmr.msra.gmra.mrb[0].mxu0 %vm390_vm1, %v371_v4 }
  0xa6   : > { %1926 = vmatprep.mubr.msk.bf16.mxu0 %vm2373_vm0, %v2372_v0 }
 0x178   : > { %v428_v6 = vpop.f32.mrb[0].mxu0 }
 0x179   : > { %v429_v7 = vadd.f32 %v1826_v5, %v428_v6  ;;  %v1916_v8 = vpop.f32.mrb[1].mxu0 }
 0x17a   : > { %v431_v9 = vpop.f32.mrb[2].mxu0 }
 0x17b   : > { %441 = vrot.lane.b32.xlu1 %v429_v7, %s2374_s29  ;;  %435 = vrot.lane.b32.xlu0 %v429_v7, %s2375_s21  ;;  %v1917_v10 = vpop.f32.mrb[3].mxu0  ;;  %v2671_v11 = vpack.c.bf16 %v429_v7, %v429_v7 }
 0x17f   : > { %438 = vrot.lane.b32.xlu0 %v429_v7, %s2376_s0  ;;  %449 = vrot.lane.b32.xlu1 %v2671_v11, %s2377_s10 }
 0x1ed   : > { %v442_v12 = vpop.permute.xlu1 %441  ;;  %v436_v13 = vpop.permute.xlu0 %435 }
 0x1ee   : > { %v2676_v14 = vpack.c.bf16 %v436_v13, %v436_v13  ;;  %v2680_v17 = vpack.c.bf16 %v442_v12, %v442_v12 }
 0x1f0   : > { %499 = vrot.lane.b32.xlu0 %v2676_v14, %s2377_s10 }
 0x1f1   : > { %v439_v15 = vpop.permute.xlu0 %438  ;;  %v450_v16 = vpop.permute.xlu1 %449 }
 0x1f2   : > { %v2682_v18 = vpack.c.bf16 %v439_v15, %v439_v15  ;;  %v456_v19 = vsel %vm451_vm2, %v450_v16, 0 }
 0x1f3   : > { %1919 = vmatpush3.bf16.xpose.msra.mxu1 %v456_v19 }
 0x1f4   : > { %597 = vrot.lane.b32.xlu0 %v2680_v17, %s2377_s10  ;;  %548 = vrot.lane.b32.xlu1 %v2682_v18, %s2377_s10 }
 0x1f5   : > { %1930 = vmatprep.subr.bf16.mxu1 %v2372_v0 }
 0x1fa   : > { %1921 = vmatmul.mubr.msk.bf16.vlgmr.msra.gmra.mrb[0].mxu1 %vm451_vm2, %v2671_v11 }
 0x1fb   : > { %1932 = vmatprep.mubr.msk.bf16.mxu1 %vm2373_vm0, %v2372_v0 }
 0x262   : > { %v500_v20 = vpop.permute.xlu0 %499 }
 0x263   : > { %v505_v21 = vsel %vm451_vm2, %v500_v20, 0 }
 0x264   : > { %1925 = vmatpush3.bf16.xpose.msra.mxu0 %v505_v21 }
 0x265   : > { %1936 = vmatprep.subr.bf16.mxu0 %v2372_v0 }
 0x266   : > { %v549_v22 = vpop.permute.xlu1 %548  ;;  %v598_v24 = vpop.permute.xlu0 %597 }
 0x267   : > { %v554_v23 = vsel %vm451_vm2, %v549_v22, 0  ;;  %v603_v25 = vsel %vm451_vm2, %v598_v24, 0 }
 0x268   : > { %1931 = vmatpush3.bf16.xpose.msra.mxu1 %v554_v23 }
 0x269   : > { %1942 = vmatprep.subr.bf16.mxu1 %v2372_v0 }
 0x26b   : > { %1927 = vmatmul.mubr.msk.bf16.vlgmr.msra.gmra.mrb[4].mxu0 %vm451_vm2, %v2676_v14 }
 0x26c   : > { %1937 = vmatpush3.bf16.xpose.msra.mxu0 %v603_v25  ;;  %1938 = vmatprep.mubr.msk.bf16.mxu0 %vm2373_vm0, %v2372_v0 }
 0x26d   : > { %1948 = vmatprep.subr.bf16.mxu0 %v2372_v0 }
 0x26f   : > { %1933 = vmatmul.mubr.msk.bf16.vlgmr.msra.gmra.mrb[4].mxu1 %vm451_vm2, %v2682_v18 }
 0x270   : > { %1944 = vmatprep.mubr.msk.bf16.mxu1 %vm2373_vm0, %v2372_v0 }
 0x273   : > { %1939 = vmatmul.mubr.msk.bf16.vlgmr.msra.gmra.mrb[8].mxu0 %vm451_vm2, %v2680_v17 }
 0x274   : > { %1950 = vmatprep.mubr.msk.bf16.mxu0 %vm2373_vm0, %v2372_v0 }
 0x2cd   : > { %v492_v26 = vpop.f32.mrb[0].mxu1 }
 0x2ce   : > { %v645_v28 = vmul.f32 0.35355338, %v492_v26  ;;  %v1922_v29 = vpop.f32.mrb[1].mxu1 }
 0x2cf   : > { %v495_v30 = vpop.f32.mrb[2].mxu1 }
 0x2d0   : > { %v1923_v31 = vpop.f32.mrb[3].mxu1  ;;  %v655_v32 = vadd.f32 %v2714_v27, %v645_v28 }
 0x2d2   : > { %v659_v33 = vsel %vm451_vm2, %v655_v32, -inf }
 0x2d3   : > { %660 = vmax.xlane.f32.xlu1 %v659_v33 }
 0x33e   : > { %v541_v34 = vpop.f32.mrb[4].mxu0 }
 0x33f   : > { %v646_v35 = vmul.f32 0.35355338, %v541_v34  ;;  %v1928_v36 = vpop.f32.mrb[5].mxu0 }
 0x340   : > { %v544_v37 = vpop.f32.mrb[6].mxu0 }
 0x341   : > { %v1929_v38 = vpop.f32.mrb[7].mxu0  ;;  %v656_v39 = vadd.f32 %v2714_v27, %v646_v35 }
 0x342   : > { %v590_v40 = vpop.f32.mrb[4].mxu1 }
 0x343   : > { %v647_v41 = vmul.f32 0.35355338, %v590_v40  ;;  %v1934_v42 = vpop.f32.mrb[5].mxu1  ;;  %v662_v43 = vsel %vm451_vm2, %v656_v39, -inf }
 0x344   : > { %v593_v44 = vpop.f32.mrb[6].mxu1  ;;  %663 = vmax.xlane.f32.xlu0 %v662_v43  ;;  %v2124_v42 = vld [vmem:[#allocation8] sm:$0xff]   ;;  %v2125_v43 = vld [vmem:[#allocation8 + $0x8] sm:$0xff]  }
 0x345   : > { %v1935_v45 = vpop.f32.mrb[7].mxu1  ;;  %v657_v46 = vadd.f32 %v2714_v27, %v647_v41 }
 0x346   : > { %v639_v47 = vpop.f32.mrb[8].mxu0 }
 0x347   : > { %v648_v48 = vmul.f32 0.35355338, %v639_v47  ;;  %v1940_v49 = vpop.f32.mrb[9].mxu0  ;;  %v665_v50 = vsel %vm451_vm2, %v657_v46, -inf }
 0x348   : > { %v642_v51 = vpop.f32.mrb[10].mxu0  ;;  %666 = vmax.xlane.f32.xlu0 %v665_v50 }
 0x349   : > { %v1941_v52 = vpop.f32.mrb[11].mxu0  ;;  %v658_v53 = vadd.f32 %v2714_v27, %v648_v48 }
 0x34b   : > { %v668_v54 = vsel %vm451_vm2, %v658_v53, -inf }
 0x34c   : > { %669 = vmax.xlane.f32.xlu1 %v668_v54 }
 0x35d   : > { %756 = vrot.lane.b32.xlu1 %v2676_v14, %s2378_s12 }
 0x35e   : > { %707 = vrot.lane.b32.xlu0 %v2671_v11, %s2378_s12 }
 0x360   : > { %v661_v55 = vpop.xlane.xlu1 %660 }
 0x361   : > { %v671_v56 = vsub.f32 %v655_v32, %v661_v55 }
 0x363   : > { %v675_v57 = vmul.f32 1.442695, %v671_v56 }
 0x365   : > { %2130 = vpow2.f32 %v675_v57 }
 0x36f   : > { %v2131_v58 = vpop.eup %2130 }
 0x370   : > { %v683_v59 = vsel %vm451_vm2, %v2131_v58, 0.0 }
 0x37d   : > { %684 = vadd.xlane.f32.xlu0 %v683_v59 }
 0x3d1   : > { %v664_v60 = vpop.xlane.xlu0 %663 }
 0x3d2   : > { %v672_v61 = vsub.f32 %v656_v39, %v664_v60 }
 0x3d4   : > { %v677_v62 = vmul.f32 1.442695, %v672_v61 }
 0x3d5   : > { %v667_v63 = vpop.xlane.xlu0 %666 }
 0x3d6   : > { %2132 = vpow2.f32 %v677_v62  ;;  %v673_v1 = vsub.f32 %v657_v46, %v667_v63  ;;  %v1839_v63 = vld [vmem:[%s2964_s5] ss:$0 sm:$0xff] }
 0x3d8   : > { %v679_v2 = vmul.f32 1.442695, %v673_v1 }
 0x3d9   : > { %v708_v4 = vpop.permute.xlu0 %707  ;;  %v670_v5 = vpop.xlane.xlu1 %669 }
 0x3da   : > { %2134 = vpow2.f32 %v679_v2  ;;  %v714_v6 = vsel %vm712_vm3, %v708_v4, 0  ;;  %v674_v7 = vsub.f32 %v658_v53, %v670_v5 }
 0x3db   : > { %1943 = vmatpush3.bf16.msra.mxu1 %v714_v6 }
 0x3dc   : > { %v681_v8 = vmul.f32 1.442695, %v674_v7  ;;  %1954 = vmatprep.subr.bf16.mxu1 %v2372_v0 }
 0x3dd   : > { %v757_v9 = vpop.permute.xlu1 %756 }
 0x3de   : > { %2136 = vpow2.f32 %v681_v8  ;;  %v762_v10 = vsel %vm712_vm3, %v757_v9, 0 }
 0x3df   : > { %1949 = vmatpush3.bf16.msra.mxu0 %v762_v10 }
 0x3e0   : > { %v2133_v11 = vpop.eup %2132  ;;  %1960 = vmatprep.subr.bf16.mxu0 %v2372_v0 }
 0x3e1   : > { %v686_v12 = vsel %vm451_vm2, %v2133_v11, 0.0 }
 0x3e2   : > { %687 = vadd.xlane.f32.xlu1 %v686_v12 }
 0x3e4   : > { %v2135_v13 = vpop.eup %2134 }
 0x3e5   : > { %v689_v14 = vsel %vm451_vm2, %v2135_v13, 0.0 }
 0x3e6   : > { %690 = vadd.xlane.f32.xlu0 %v689_v14 }
 0x3e8   : > { %v2137_v15 = vpop.eup %2136 }
 0x3e9   : > { %v692_v16 = vsel %vm451_vm2, %v2137_v15, 0.0 }
 0x3ea   : > { %693 = vadd.xlane.f32.xlu1 %v692_v16  ;;  %v994_v16 = vlaneseq }
 0x3fb   : > { %804 = vrot.lane.b32.xlu1 %v2682_v18, %s2378_s12 }
 0x3fc   : > { %852 = vrot.lane.b32.xlu0 %v2680_v17, %s2378_s12 }
 0x40a   : > { %v685_v19 = vpop.xlane.xlu0 %684 }
 0x40b   : > { %2138 = vrcp.f32 %v685_v19 }
 0x415   : > { %v2139_v20 = vpop.eup %2138 }
 0x416   : > { %v699_v21 = vmul.f32 %v2139_v20, %v2131_v58  ;;  %v2773_v20 = vshrl.u32 %v994_v16, 7 }
 0x418   : > { %v703_v22 = vpack.c.bf16 %v699_v21, %v699_v21  ;;  %v996_v21 = vsub.s32 0, %v2773_v20 }
 0x41a   : > { %1945 = vmatmul.mubr.msk.bf16.vlgmr.msra.gmra.mrb[8].mxu1 %vm451_vm2, %v703_v22  ;;  %v370_v22 = vld [vmem:[%s2965_s6] sm:$0xf] }
 0x41b   : > { %1956 = vmatprep.mubr.msk.bf16.mxu1 %vm2373_vm0, %v2372_v0 }
 0x46f   : > { %v688_v23 = vpop.xlane.xlu1 %687 }
 0x470   : > { %2140 = vrcp.f32 %v688_v23  ;;  %v1001_v23 = vsub.s32 1, %v2773_v20 }
 0x473   : > { %v691_v24 = vpop.xlane.xlu0 %690 }
 0x474   : > { %2142 = vrcp.f32 %v691_v24  ;;  %v997_v24 = vrot.slane %v370_v22, %v996_v21 }
 0x477   : > { %v694_v25 = vpop.xlane.xlu1 %693  ;;  %v853_v17 = vpop.permute.xlu0 %852 }
 0x478   : > { %2144 = vrcp.f32 %v694_v25  ;;  %v858_v33 = vsel %vm712_vm3, %v853_v17, 0 }
 0x47a   : > { %v2141_v18 = vpop.eup %2140 }
 0x47b   : > { %v700_v26 = vmul.f32 %v2141_v18, %v2133_v11  ;;  %v805_v28 = vpop.permute.xlu1 %804 }
 0x47c   : > { %v810_v29 = vsel %vm712_vm3, %v805_v28, 0 }
 0x47d   : > { %1955 = vmatpush3.bf16.msra.mxu1 %v810_v29  ;;  %v704_v30 = vpack.c.bf16 %v700_v26, %v700_v26  ;;  %v1002_v26 = vrot.slane %v370_v22, %v1001_v23 }
 0x47e   : > { %v2143_v31 = vpop.eup %2142  ;;  %1966 = vmatprep.subr.bf16.mxu1 %v2372_v0 }
 0x47f   : > { %v701_v32 = vmul.f32 %v2143_v31, %v2135_v13  ;;  %1951 = vmatmul.mubr.msk.bf16.vlgmr.msra.gmra.mrb[12].mxu0 %vm451_vm2, %v704_v30 }
 0x480   : > { %1961 = vmatpush3.bf16.msra.mxu0 %v858_v33  ;;  %1962 = vmatprep.mubr.msk.bf16.mxu0 %vm2373_vm0, %v2372_v0 }
 0x481   : > { %v705_v34 = vpack.c.bf16 %v701_v32, %v701_v32  ;;  %1974 = vmatprep.subr.bf16.mxu0 %v2372_v0 }
 0x482   : > { %v2145_v35 = vpop.eup %2144 }
 0x483   : > { %v702_v36 = vmul.f32 %v2145_v35, %v2137_v15  ;;  %1957 = vmatmul.mubr.msk.bf16.vlgmr.msra.gmra.mrb[12].mxu1 %vm451_vm2, %v705_v34 }
 0x484   : > { %1970 = vmatprep.mubr.msk.bf16.mxu1 %vm2373_vm0, %v2372_v0  ;;  %1967 = vmatpush3.bf16.msra.mxu1 %v2124_v42 }
 0x485   : > { %v706_v37 = vpack.c.bf16 %v702_v36, %v702_v36  ;;  %1968 = vmatprep.subr.bf16.mxu1 %v2372_v0  ;;  %v2126_v36 = vld [vmem:[#allocation7 + $0x10] sm:$0xff]  }
 0x487   : > { %1963 = vmatmul.mubr.msk.bf16.vlgmr.msra.gmra.mrb[16].mxu0 %vm451_vm2, %v706_v37  ;;  %v2127_v37 = vld [vmem:[#allocation7 + $0x18] sm:$0xff]  }
 0x488   : > { %1978 = vmatprep.mubr.msk.bf16.mxu0 %vm2373_vm0, %v2372_v0  ;;  %1969 = vmatpush3.bf16.msra.mxu1 %v2125_v43 }
 0x489   : > { %1982 = vmatprep.subr.bf16.mxu1 %v2372_v0  ;;  %1975 = vmatpush3.bf16.msra.mxu0 %v2126_v36 }
 0x48a   : > { %1976 = vmatprep.subr.bf16.mxu0 %v2372_v0 }
 0x48d   : > { %1977 = vmatpush3.bf16.msra.mxu0 %v2127_v37 }
 0x48e   : > { %1988 = vmatprep.subr.bf16.mxu0 %v2372_v0 }
 0x4ed   : > { %v750_v38 = vpop.f32.mrb[8].mxu1 }
 0x4ee   : > { %v1946_v39 = vpop.f32.mrb[9].mxu1 }
 0x4ef   : > { %v753_v40 = vpop.f32.mrb[10].mxu1 }
 0x4f0   : > { %v1947_v41 = vpop.f32.mrb[11].mxu1  ;;  %v1020_v40 = vsub.s32 2, %v2773_v20 }
 0x4f1   : > { %v1025_v41 = vsub.s32 3, %v2773_v20 }
 0x4f2   : > { %v1021_v42 = vrot.slane %v370_v22, %v1020_v40 }
 0x552   : > { %v798_v44 = vpop.f32.mrb[12].mxu0 }
 0x553   : > { %901 = vrot.lane.b32.xlu1 %v798_v44, %s2379_s15  ;;  %v1952_v45 = vpop.f32.mrb[13].mxu0  ;;  %v1026_v44 = vrot.slane %v370_v22, %v1025_v41 }
 0x554   : > { %v801_v46 = vpop.f32.mrb[14].mxu0 }
 0x555   : > { %v1953_v47 = vpop.f32.mrb[15].mxu0 }
 0x556   : > { %v846_v48 = vpop.f32.mrb[12].mxu1 }
 0x557   : > { %905 = vrot.lane.b32.xlu0 %v846_v48, %s2380_s19  ;;  %v1958_v49 = vpop.f32.mrb[13].mxu1 }
 0x558   : > { %v849_v50 = vpop.f32.mrb[14].mxu1  ;;  %v1846_v49 = vld [vmem:[%s2962_s3 + $0x1] ss:$0 sm:$0xff] }
 0x559   : > { %v1959_v51 = vpop.f32.mrb[15].mxu1 }
 0x55a   : > { %v894_v52 = vpop.f32.mrb[16].mxu0 }
 0x55b   : > { %909 = vrot.lane.b32.xlu1 %v894_v52, %s2381_s14  ;;  %v1964_v53 = vpop.f32.mrb[17].mxu0 }
 0x55c   : > { %v897_v54 = vpop.f32.mrb[18].mxu0 }
 0x55d   : > { %v1965_v55 = vpop.f32.mrb[19].mxu0 }
 0x5c5   : > { %v902_v56 = vpop.permute.xlu1 %901 }
 0x5c6   : > { %v912_v58 = vsel %vm451_vm2, %v750_v38, %v902_v56 }
 0x5c9   : > { %v906_v57 = vpop.permute.xlu0 %905 }
 0x5ca   : > { %v914_v59 = vsel %vm913_vm4, %v912_v58, %v906_v57 }
 0x5cd   : > { %v910_v60 = vpop.permute.xlu1 %909 }
 0x5ce   : > { %v916_v61 = vsel %vm915_vm5, %v914_v59, %v910_v60 }
 0x5cf   : > { %v917_v62 = vpack.c.bf16 %v916_v61, %v916_v61 }
 0x5d1   : > { %1971 = vmatmul.mubr.msk.bf16.vlgmr.msra.gmra.mrb[16].mxu1 %vm390_vm1, %v917_v62 }
 0x5d2   : > { %1984 = vmatprep.mubr.msk.bf16.mxu1 %vm2373_vm0, %v2372_v0 }
 0x6a4   : > { %v973_v1 = vpop.f32.mrb[16].mxu1 }
 0x6a5   : > { %v974_v2 = vadd.f32 %v1839_v63, %v973_v1  ;;  %v1972_v4 = vpop.f32.mrb[17].mxu1 }
 0x6a6   : > { %v976_v5 = vpop.f32.mrb[18].mxu1 }
 0x6a7   : > { %v1973_v6 = vpop.f32.mrb[19].mxu1  ;;  %v979_v7 = vadd.f32 %v974_v2, %v2657_v3 }
 0x6a9   : > { %v980_v8 = vsel %vm390_vm1, %v979_v7, 0.0 }
 0x6aa   : > { %981 = vadd.xlane.f32.xlu0 %v980_v8 }
 0x737   : > { %v982_v9 = vpop.xlane.xlu0 %981 }
 0x738   : > { %v984_v10 = vmul.f32 0.03125, %v982_v9 }
 0x73a   : > { %v985_v11 = vsub.f32 %v979_v7, %v984_v10 }
 0x73c   : > { %v986_v12 = vmul.f32 %v985_v11, %v985_v11 }
 0x73e   : > { %v987_v13 = vsel %vm390_vm1, %v986_v12, 0.0 }
 0x73f   : > { %988 = vadd.xlane.f32.xlu1 %v987_v13 }
 0x7cc   : > { %v989_v14 = vpop.xlane.xlu1 %988 }
 0x7cd   : > { %v990_v15 = vmul.f32 0.03125, %v989_v14 }
 0x7cf   : > { %v991_v19 = vadd.f32 1e-05, %v990_v15 }
 0x7d1   : > { %2146 = vrsqrt.f32 %v991_v19 }
 0x7db   : > { %v2147_v25 = vpop.eup %2146 }
 0x7dc   : > { %v993_v18 = vmul.f32 %v2147_v25, %v985_v11 }
 0x7de   : > { %v998_v28 = vmul.f32 %v997_v24, %v993_v18 }
 0x7e0   : > { %v1003_v17 = vadd.f32 %v1002_v26, %v998_v28 }
 0x7e2   : > { %v1004_v29 = vadd.f32 %v1003_v17, %v2657_v3 }
 0x7e4   : > { %v1005_v30 = vsel %vm390_vm1, %v1004_v29, 0.0 }
 0x7e5   : > { %1006 = vadd.xlane.f32.xlu0 %v1005_v30 }
 0x872   : > { %v1007_v31 = vpop.xlane.xlu0 %1006 }
 0x873   : > { %v1008_v32 = vmul.f32 0.03125, %v1007_v31 }
 0x875   : > { %v1009_v33 = vsub.f32 %v1004_v29, %v1008_v32 }
 0x877   : > { %v1010_v34 = vmul.f32 %v1009_v33, %v1009_v33 }
 0x879   : > { %v1011_v35 = vsel %vm390_vm1, %v1010_v34, 0.0 }
 0x87a   : > { %1012 = vadd.xlane.f32.xlu0 %v1011_v35 }
 0x907   : > { %v1013_v38 = vpop.xlane.xlu0 %1012 }
 0x908   : > { %v1014_v3 = vmul.f32 0.03125, %v1013_v38 }
 0x90a   : > { %v1015_v39 = vadd.f32 1e-05, %v1014_v3 }
 0x90c   : > { %2148 = vrsqrt.f32 %v1015_v39 }
 0x916   : > { %v2149_v43 = vpop.eup %2148 }
 0x917   : > { %v1017_v45 = vmul.f32 %v2149_v43, %v1009_v33 }
 0x919   : > { %v1022_v46 = vmul.f32 %v1021_v42, %v1017_v45 }
 0x91b   : > { %v2795_v47 = vadd.f32 %v1026_v44, %v1022_v46 }
 0x91d   : > { %v1044_v48 = vpack.c.bf16 %v2795_v47, %v2795_v47 }
 0x91f   : > { %1979 = vmatmul.mubr.msk.bf16.vlgmr.msra.gmra.mrb[20].mxu0 %vm390_vm1, %v1044_v48 }
 0x920   : > { %1990 = vmatprep.mubr.msk.bf16.mxu0 %vm2373_vm0, %v2372_v0 }
 0x9f2   : > { %v1100_v50 = vpop.f32.mrb[20].mxu0 }
 0x9f3   : > { %v1101_v51 = vadd.f32 %v1846_v49, %v1100_v50  ;;  %v1980_v52 = vpop.f32.mrb[21].mxu0 }
 0x9f4   : > { %v1103_v53 = vpop.f32.mrb[22].mxu0 }
 0x9f5   : > { %1110 = vrot.lane.b32.xlu0 %v1101_v51, %s2376_s0  ;;  %1107 = vrot.lane.b32.xlu1 %v1101_v51, %s2375_s21  ;;  %v1981_v54 = vpop.f32.mrb[23].mxu0  ;;  %v2808_v55 = vpack.c.bf16 %v1101_v51, %v1101_v51 }
 0x9f9   : > { %1113 = vrot.lane.b32.xlu1 %v1101_v51, %s2374_s29 }
 0x9fd   : > { %1121 = vrot.lane.b32.xlu1 %v2808_v55, %s2377_s10 }
 0xa67   : > { %v1111_v56 = vpop.permute.xlu0 %1110  ;;  %v1108_v57 = vpop.permute.xlu1 %1107 }
 0xa68   : > { %v2812_v58 = vpack.c.bf16 %v1111_v56, %v1111_v56  ;;  %v1117_v59 = vpack.c.bf16 %v1108_v57, %v1108_v57 }
 0xa6a   : > { %1170 = vrot.lane.b32.xlu0 %v1117_v59, %s2377_s10  ;;  %1219 = vrot.lane.b32.xlu1 %v2812_v58, %s2377_s10 }
 0xa6b   : > { %v1114_v60 = vpop.permute.xlu1 %1113 }
 0xa6c   : > { %v2817_v61 = vpack.c.bf16 %v1114_v60, %v1114_v60 }
 0xa6e   : > { %1268 = vrot.lane.b32.xlu0 %v2817_v61, %s2377_s10  ;;  %s1863_s10 = sshll.u32 %s2444_s28, 7  ;;  %s2382_s28 = smov [#allocation10]  }
 0xa6f   : > { %v1122_v62 = vpop.permute.xlu1 %1121  ;;  %s2914_s23 = scalar_lea.hbm %s2966_s7, %s1863_s10 }
 0xa70   : > { %v1127_v63 = vsel %vm451_vm2, %v1122_v62, 0 }
 0xa71   : > { %1983 = vmatpush3.bf16.xpose.msra.mxu1 %v1127_v63 }
 0xa72   : > { %1994 = vmatprep.subr.bf16.mxu1 %v2372_v0 }
 0xa78   : > { %1985 = vmatmul.mubr.msk.bf16.vlgmr.msra.gmra.mrb[20].mxu1 %vm451_vm2, %v2808_v55 }
 0xa79   : > { %1996 = vmatprep.mubr.msk.bf16.mxu1 %vm2373_vm0, %v2372_v0 }
 0xadc   : > { %v1171_v1 = vpop.permute.xlu0 %1170  ;;  %v1220_v2 = vpop.permute.xlu1 %1219 }
 0xadd   : > { %v1176_v4 = vsel %vm451_vm2, %v1171_v1, 0  ;;  %v1225_v5 = vsel %vm451_vm2, %v1220_v2, 0 }
 0xade   : > { %1989 = vmatpush3.bf16.xpose.msra.mxu0 %v1176_v4  ;;  %1995 = vmatpush3.bf16.xpose.msra.mxu1 %v1225_v5 }
 0xadf   : > { %2000 = vmatprep.subr.bf16.mxu0 %v2372_v0  ;;  %2006 = vmatprep.subr.bf16.mxu1 %v2372_v0 }
 0xae0   : > { %v1269_v6 = vpop.permute.xlu0 %1268 }
 0xae1   : > { %v1274_v7 = vsel %vm451_vm2, %v1269_v6, 0 }
 0xae5   : > { %1991 = vmatmul.mubr.msk.bf16.vlgmr.msra.gmra.mrb[24].mxu0 %vm451_vm2, %v1117_v59  ;;  %1997 = vmatmul.mubr.msk.bf16.vlgmr.msra.gmra.mrb[24].mxu1 %vm451_vm2, %v2812_v58 }
 0xae6   : > { %2001 = vmatpush3.bf16.xpose.msra.mxu0 %v1274_v7  ;;  %2002 = vmatprep.mubr.msk.bf16.mxu0 %vm2373_vm0, %v2372_v0 }
 0xae7   : > { %2012 = vmatprep.subr.bf16.mxu0 %v2372_v0  ;;  %2008 = vmatprep.mubr.msk.bf16.mxu1 %vm2373_vm0, %v2372_v0 }
 0xaed   : > { %2003 = vmatmul.mubr.msk.bf16.vlgmr.msra.gmra.mrb[28].mxu0 %vm451_vm2, %v2817_v61 }
 0xaee   : > { %2014 = vmatprep.mubr.msk.bf16.mxu0 %vm2373_vm0, %v2372_v0 }
 0xb4b   : > { %v1163_v8 = vpop.f32.mrb[20].mxu1 }
 0xb4c   : > { %v1316_v9 = vmul.f32 0.35355338, %v1163_v8  ;;  %v1986_v10 = vpop.f32.mrb[21].mxu1 }
 0xb4d   : > { %v1166_v11 = vpop.f32.mrb[22].mxu1 }
 0xb4e   : > { %v1987_v12 = vpop.f32.mrb[23].mxu1  ;;  %v1320_v13 = vadd.f32 %v2714_v27, %v1316_v9 }
 0xb50   : > { %v1324_v14 = vsel %vm451_vm2, %v1320_v13, -inf }
 0xb51   : > { %1325 = vmax.xlane.f32.xlu1 %v1324_v14 }
 0xbb8   : > { %v1212_v15 = vpop.f32.mrb[24].mxu0  ;;  %v1261_v16 = vpop.f32.mrb[24].mxu1 }
 0xbb9   : > { %v1317_v19 = vmul.f32 0.35355338, %v1212_v15  ;;  %v1318_v22 = vmul.f32 0.35355338, %v1261_v16  ;;  %v1992_v24 = vpop.f32.mrb[25].mxu0  ;;  %v1998_v25 = vpop.f32.mrb[25].mxu1 }
 0xbba   : > { %v1215_v18 = vpop.f32.mrb[26].mxu0  ;;  %v1264_v26 = vpop.f32.mrb[26].mxu1 }
 0xbbb   : > { %v1993_v28 = vpop.f32.mrb[27].mxu0  ;;  %v1999_v17 = vpop.f32.mrb[27].mxu1  ;;  %v1321_v29 = vadd.f32 %v2714_v27, %v1317_v19  ;;  %v1322_v31 = vadd.f32 %v2714_v27, %v1318_v22 }
 0xbbd   : > { %v1327_v30 = vsel %vm451_vm2, %v1321_v29, -inf  ;;  %v1330_v35 = vsel %vm451_vm2, %v1322_v31, -inf }
 0xbbe   : > { %1328 = vmax.xlane.f32.xlu0 %v1327_v30 }
 0xbc0   : > { %v1310_v32 = vpop.f32.mrb[28].mxu0 }
 0xbc1   : > { %v1319_v33 = vmul.f32 0.35355338, %v1310_v32  ;;  %v2004_v34 = vpop.f32.mrb[29].mxu0  ;;  %v2129_v32 = vld [vmem:[#allocation8 + $0x18] sm:$0xff]  }
 0xbc2   : > { %v1313_v36 = vpop.f32.mrb[30].mxu0  ;;  %1331 = vmax.xlane.f32.xlu0 %v1330_v35 }
 0xbc3   : > { %v2005_v37 = vpop.f32.mrb[31].mxu0  ;;  %v1323_v38 = vadd.f32 %v2714_v27, %v1319_v33 }
 0xbc5   : > { %v1333_v3 = vsel %vm451_vm2, %v1323_v38, -inf }
 0xbc6   : > { %1334 = vmax.xlane.f32.xlu1 %v1333_v3 }
 0xbd7   : > { %1420 = vrot.lane.b32.xlu1 %v1117_v59, %s2378_s12 }
 0xbd8   : > { %1372 = vrot.lane.b32.xlu0 %v2808_v55, %s2378_s12 }
 0xbde   : > { %v1326_v39 = vpop.xlane.xlu1 %1325 }
 0xbdf   : > { %v1336_v42 = vsub.f32 %v1320_v13, %v1326_v39 }
 0xbe1   : > { %v1340_v43 = vmul.f32 1.442695, %v1336_v42 }
 0xbe3   : > { %2150 = vpow2.f32 %v1340_v43 }
 0xbed   : > { %v2151_v44 = vpop.eup %2150 }
 0xbee   : > { %v1348_v45 = vsel %vm451_vm2, %v2151_v44, 0.0 }
 0xbf7   : > { %1349 = vadd.xlane.f32.xlu0 %v1348_v45 }
 0xc4b   : > { %v1329_v46 = vpop.xlane.xlu0 %1328 }
 0xc4c   : > { %v1337_v48 = vsub.f32 %v1321_v29, %v1329_v46 }
 0xc4e   : > { %v1342_v49 = vmul.f32 1.442695, %v1337_v48 }
 0xc4f   : > { %v1332_v27 = vpop.xlane.xlu0 %1331 }
 0xc50   : > { %2152 = vpow2.f32 %v1342_v49  ;;  %v1338_v50 = vsub.f32 %v1322_v31, %v1332_v27  ;;  %v2128_v31 = vld [vmem:[#allocation8 + $0x10] sm:$0xff]  }
 0xc52   : > { %v1344_v51 = vmul.f32 1.442695, %v1338_v50 }
 0xc53   : > { %v1335_v52 = vpop.xlane.xlu1 %1334  ;;  %v1373_v53 = vpop.permute.xlu0 %1372 }
 0xc54   : > { %2154 = vpow2.f32 %v1344_v51  ;;  %v1339_v54 = vsub.f32 %v1323_v38, %v1335_v52  ;;  %v1378_v55 = vsel %vm712_vm3, %v1373_v53, 0  ;;  %v1858_v52 = vld [vmem:[%s2964_s5 + $0x1] ss:$0 sm:$0xff] }
 0xc55   : > { %2007 = vmatpush3.bf16.msra.mxu1 %v1378_v55 }
 0xc56   : > { %v1346_v56 = vmul.f32 1.442695, %v1339_v54  ;;  %2018 = vmatprep.subr.bf16.mxu1 %v2372_v0 }
 0xc57   : > { %v1421_v57 = vpop.permute.xlu1 %1420 }
 0xc58   : > { %2156 = vpow2.f32 %v1346_v56  ;;  %v1426_v59 = vsel %vm712_vm3, %v1421_v57, 0 }
 0xc59   : > { %2013 = vmatpush3.bf16.msra.mxu0 %v1426_v59 }
 0xc5a   : > { %v2153_v60 = vpop.eup %2152  ;;  %2024 = vmatprep.subr.bf16.mxu0 %v2372_v0 }
 0xc5b   : > { %v1351_v62 = vsel %vm451_vm2, %v2153_v60, 0.0 }
 0xc5c   : > { %1352 = vadd.xlane.f32.xlu1 %v1351_v62 }
 0xc5e   : > { %v2155_v63 = vpop.eup %2154 }
 0xc5f   : > { %v1354_v1 = vsel %vm451_vm2, %v2155_v63, 0.0 }
 0xc60   : > { %1355 = vadd.xlane.f32.xlu0 %v1354_v1 }
 0xc62   : > { %v2157_v2 = vpop.eup %2156 }
 0xc63   : > { %v1357_v4 = vsel %vm451_vm2, %v2157_v2, 0.0 }
 0xc64   : > { %1358 = vadd.xlane.f32.xlu1 %v1357_v4 }
 0xc75   : > { %1468 = vrot.lane.b32.xlu1 %v2812_v58, %s2378_s12 }
 0xc76   : > { %1516 = vrot.lane.b32.xlu0 %v2817_v61, %s2378_s12  ;;  %s356_s12 = scalar_lea.vmem [#allocation10], %s1822_s9  ;;  %s2290_s9 = sshll.u32 %s2382_s28, 4  ;;  %s2291_s9 = int_to_ptr.vmem [resolvable:$false] %s2290_s9 }
 0xc77   : > { %s2292_s20 = scalar_lea.vmem %s2291_s9, 256 }
 0xc84   : > { %v1350_v5 = vpop.xlane.xlu0 %1349 }
 0xc85   : > { %2158 = vrcp.f32 %v1350_v5 }
 0xc8f   : > { %v2159_v6 = vpop.eup %2158 }
 0xc90   : > { %v1364_v7 = vmul.f32 %v2159_v6, %v2151_v44 }
 0xc92   : > { %v1368_v8 = vpack.c.bf16 %v1364_v7, %v1364_v7 }
 0xc94   : > { %2009 = vmatmul.mubr.msk.bf16.vlgmr.msra.gmra.mrb[28].mxu1 %vm451_vm2, %v1368_v8  ;;  %v1845_v8 = vld [vmem:[%s2965_s6 + $0x4] sm:$0xf] }
 0xc95   : > { %2020 = vmatprep.mubr.msk.bf16.mxu1 %vm2373_vm0, %v2372_v0 }
 0xce9   : > { %v1353_v9 = vpop.xlane.xlu1 %1352 }
 0xcea   : > { %2160 = vrcp.f32 %v1353_v9  ;;  %v1658_v9 = vrot.slane %v1845_v8, %v996_v21 }
 0xced   : > { %v1356_v10 = vpop.xlane.xlu0 %1355 }
 0xcee   : > { %2162 = vrcp.f32 %v1356_v10 }
 0xcf1   : > { %v1359_v11 = vpop.xlane.xlu1 %1358  ;;  %v1517_v61 = vpop.permute.xlu0 %1516 }
 0xcf2   : > { %2164 = vrcp.f32 %v1359_v11  ;;  %v1522_v22 = vsel %vm712_vm3, %v1517_v61, 0 }
 0xcf4   : > { %v2161_v58 = vpop.eup %2160 }
 0xcf5   : > { %v1365_v12 = vmul.f32 %v2161_v58, %v2153_v60  ;;  %v1469_v13 = vpop.permute.xlu1 %1468  ;;  %v1663_v58 = vrot.slane %v1845_v8, %v1001_v23 }
 0xcf6   : > { %v1474_v14 = vsel %vm712_vm3, %v1469_v13, 0 }
 0xcf7   : > { %2019 = vmatpush3.bf16.msra.mxu1 %v1474_v14  ;;  %v1369_v15 = vpack.c.bf16 %v1365_v12, %v1365_v12 }
 0xcf8   : > { %v2163_v16 = vpop.eup %2162  ;;  %2030 = vmatprep.subr.bf16.mxu1 %v2372_v0 }
 0xcf9   : > { %v1366_v19 = vmul.f32 %v2163_v16, %v2155_v63  ;;  %2015 = vmatmul.mubr.msk.bf16.vlgmr.msra.gmra.mrb[32].mxu0 %vm451_vm2, %v1369_v15 }
 0xcfa   : > { %2025 = vmatpush3.bf16.msra.mxu0 %v1522_v22  ;;  %2026 = vmatprep.mubr.msk.bf16.mxu0 %vm2373_vm0, %v2372_v0 }
 0xcfb   : > { %v1370_v24 = vpack.c.bf16 %v1366_v19, %v1366_v19 }
 0xcfc   : > { %v2165_v25 = vpop.eup %2164 }
 0xcfd   : > { %v1367_v18 = vmul.f32 %v2165_v25, %v2157_v2  ;;  %2021 = vmatmul.mubr.msk.bf16.vlgmr.msra.gmra.mrb[32].mxu1 %vm451_vm2, %v1370_v24 }
 0xcfe   : > { %2034 = vmatprep.mubr.msk.bf16.mxu1 %vm2373_vm0, %v2372_v0  ;;  %2031 = vmatpush3.bf16.msra.mxu1 %v2128_v31 }
 0xcff   : > { %v1371_v26 = vpack.c.bf16 %v1367_v18, %v1367_v18  ;;  %2032 = vmatprep.subr.bf16.mxu1 %v2372_v0 }
 0xd01   : > { %2027 = vmatmul.mubr.msk.bf16.vlgmr.msra.gmra.mrb[36].mxu0 %vm451_vm2, %v1371_v26  ;;  %v1687_v26 = vrot.slane %v1845_v8, %v1025_v41 }
 0xd02   : > { %2033 = vmatpush3.bf16.msra.mxu1 %v2129_v32 }
 0xd67   : > { %v1414_v28 = vpop.f32.mrb[28].mxu1 }
 0xd68   : > { %v2010_v17 = vpop.f32.mrb[29].mxu1 }
 0xd69   : > { %v1417_v29 = vpop.f32.mrb[30].mxu1 }
 0xd6a   : > { %v2011_v30 = vpop.f32.mrb[31].mxu1 }
 0xdcc   : > { %v1462_v33 = vpop.f32.mrb[32].mxu0 }
 0xdcd   : > { %1565 = vrot.lane.b32.xlu1 %v1462_v33, %s2379_s15  ;;  %v2016_v34 = vpop.f32.mrb[33].mxu0  ;;  %s1704_s15 = sshll.u32 %s356_s12, 4  ;;  %s2916_s15 = int_to_ptr.vmem [resolvable:$true] %s1704_s15 }
 0xdce   : > { %v1465_v35 = vpop.f32.mrb[34].mxu0  ;;  %s2286_s11 = scalar_lea.vmem %s2916_s15, 128  ;;  %p2293_p4 = scmp.lt.s32.totalorder %s2916_s15, %s2291_s9 }
 0xdcf   : > { %v2017_v36 = vpop.f32.mrb[35].mxu0  ;;  %p2287_p2 = scmp.ne.s32.totalorder %s2916_s15, %s2286_s11  ;;  %p2294_p5 = scmp.lt.s32.totalorder %s2292_s20, %s2286_s11 }
 0xdd0   : > { %v1510_v37 = vpop.f32.mrb[32].mxu1 }
 0xdd1   : > { %1569 = vrot.lane.b32.xlu0 %v1510_v37, %s2380_s19  ;;  %v2022_v38 = vpop.f32.mrb[33].mxu1  ;;  %p2288_p6 = pnand %p2287_p2, %p2991_p13  ;;  %p2295_p3 = por %p2294_p5, %p2293_p4 }
 0xdd2   : > { %v1513_v3 = vpop.f32.mrb[34].mxu1 }
 0xdd3   : > { %v2023_v39 = vpop.f32.mrb[35].mxu1  ;;  %p2289_p10 = pneg %p2288_p6 }
 0xdd4   : > { %v1558_v42 = vpop.f32.mrb[36].mxu0 }
 0xdd5   : > { %1573 = vrot.lane.b32.xlu1 %v1558_v42, %s2381_s14  ;;  %v2028_v43 = vpop.f32.mrb[37].mxu0  ;;  %p2296_p7 = pnand %p2295_p3, %p2289_p10 }
 0xdd6   : > { %v1561_v44 = vpop.f32.mrb[38].mxu0 }
 0xdd7   : > { %v2029_v0 = vpop.f32.mrb[39].mxu0 }
 0xe3f   : > { %v1566_v45 = vpop.permute.xlu1 %1565 }
 0xe40   : > { %v1576_v48 = vsel %vm451_vm2, %v1414_v28, %v1566_v45 }
 0xe43   : > { %v1570_v46 = vpop.permute.xlu0 %1569 }
 0xe44   : > { %v1577_v49 = vsel %vm913_vm4, %v1576_v48, %v1570_v46 }
 0xe47   : > { %v1574_v27 = vpop.permute.xlu1 %1573 }
 0xe48   : > { %v1578_v50 = vsel %vm915_vm5, %v1577_v49, %v1574_v27 }
 0xe49   : > { %v1579_v51 = vpack.c.bf16 %v1578_v50, %v1578_v50 }
 0xe4b   : > { %2035 = vmatmul.mubr.msk.bf16.vlgmr.msra.gmra.mrb[36].mxu1 %vm390_vm1, %v1579_v51 }
 0xf1e   : > { %v1635_v53 = vpop.f32.mrb[36].mxu1 }
 0xf1f   : > { %v1636_v54 = vadd.f32 %v1858_v52, %v1635_v53  ;;  %v2036_v55 = vpop.f32.mrb[37].mxu1 }
 0xf20   : > { %v1638_v56 = vpop.f32.mrb[38].mxu1 }
 0xf21   : > { %v2037_v57 = vpop.f32.mrb[39].mxu1  ;;  %v1641_v59 = vadd.f32 %v1636_v54, %v2795_v47 }
 0xf23   : > { %v1642_v60 = vsel %vm390_vm1, %v1641_v59, 0.0 }
 0xf24   : > { %1643 = vadd.xlane.f32.xlu0 %v1642_v60 }
 0xfb1   : > { %v1644_v62 = vpop.xlane.xlu0 %1643 }
 0xfb2   : > { %v1645_v63 = vmul.f32 0.03125, %v1644_v62 }
 0xfb4   : > { %v1646_v1 = vsub.f32 %v1641_v59, %v1645_v63 }
 0xfb6   : > { %v1647_v2 = vmul.f32 %v1646_v1, %v1646_v1 }
 0xfb8   : > { %v1648_v4 = vsel %vm390_vm1, %v1647_v2, 0.0 }
 0xfb9   : > { %1649 = vadd.xlane.f32.xlu1 %v1648_v4 }
0x1046   : > { %v1650_v5 = vpop.xlane.xlu1 %1649 }
0x1047   : > { %v1651_v6 = vmul.f32 0.03125, %v1650_v5 }
0x1049   : > { %v1652_v7 = vadd.f32 1e-05, %v1651_v6 }
0x104b   : > { %2166 = vrsqrt.f32 %v1652_v7 }
0x1055   : > { %v2167_v10 = vpop.eup %2166 }
0x1056   : > { %v1654_v11 = vmul.f32 %v2167_v10, %v1646_v1 }
0x1058   : > { %v1659_v12 = vmul.f32 %v1658_v9, %v1654_v11 }
0x105a   : > { %v1664_v13 = vadd.f32 %v1663_v58, %v1659_v12 }
0x105c   : > { %v1665_v61 = vadd.f32 %v1664_v13, %v2795_v47  ;;  %v1682_v47 = vrot.slane %v1845_v8, %v1020_v40 }
0x105e   : > { %v1666_v14 = vsel %vm390_vm1, %v1665_v61, 0.0 }
0x105f   : > { %1667 = vadd.xlane.f32.xlu0 %v1666_v14 }
0x10ec   : > { %v1668_v15 = vpop.xlane.xlu0 %1667 }
0x10ed   : > { %v1669_v16 = vmul.f32 0.03125, %v1668_v15 }
0x10ef   : > { %v1670_v19 = vsub.f32 %v1665_v61, %v1669_v16 }
0x10f1   : > { %v1671_v22 = vmul.f32 %v1670_v19, %v1670_v19 }
0x10f3   : > { %v1672_v21 = vsel %vm390_vm1, %v1671_v22, 0.0 }
0x10f4   : > { %1673 = vadd.xlane.f32.xlu0 %v1672_v21 }
0x1181   : > { %v1674_v24 = vpop.xlane.xlu0 %1673 }
0x1182   : > { %v1675_v25 = vmul.f32 0.03125, %v1674_v24 }
0x1184   : > { %v1676_v23 = vadd.f32 1e-05, %v1675_v25 }
0x1186   : > { %2168 = vrsqrt.f32 %v1676_v23 }
0x1190   : > { %v2169_v18 = vpop.eup %2168 }
0x1191   : > { %v1678_v28 = vmul.f32 %v2169_v18, %v1670_v19 }
0x1193   : > { %v1683_v17 = vmul.f32 %v1682_v47, %v1678_v28 }
0x1195   : > { %v1688_v29 = vadd.f32 %v1687_v26, %v1683_v17 }
0x1197   : > { %1689 = vst.msk [vmem:[%s356_s12] sm:$0xff] %vm390_vm1, %v1688_v29 }
0x1198   : > { %2299 = shalt.err (!%p2296_p7)
}
0x1199   : > { %s2300_s4 = scalar_lea.hbm %s2914_s23, 128  ;;  %s2304_s2 = scalar_lea.hbm %s2966_s7, 256 }
0x119a   : > { %p2301_p1 = scmp.ne.s32.totalorder %s2914_s23, %s2300_s4  ;;  %p2305_p11 = scmp.lt.u32.totalorder %s2914_s23, %s2966_s7 }
0x119b   : > { %p2306_p9 = scmp.lt.u32.totalorder %s2304_s2, %s2300_s4  ;;  %p2308_p2 = scmp.lt.u32.totalorder %s2300_s4, %s2914_s23 }
0x119c   : > { %p2302_p0 = pnand %p2301_p1, %p2991_p13 }
0x119d   : > { %p2307_p12 = por %p2306_p9, %p2305_p11 }
0x119e   : > { %p2303_p8 = pneg %p2302_p0 }
0x119f   : > { %p2309_p6 = por %p2308_p2, %p2307_p12 }
0x11a1   : > { %p2310_p10 = pnand %p2309_p6, %p2303_p8 }
0x11a3   : > { %2313 = shalt.err (!%p2310_p10)
}
0x11a4   : > { %2050 = dma.vmem_to_hbm [thread:$0]  (%p2991_p13), %s2916_s15, 128, %s2914_s23, %s1691_s18  }
0x11a5 PF: > { %s1716_s0 = sand.u32 1, %s2352_s24   ;;  %p2992_p4 = scmp.ne.s32.totalorder %s2975_s8, 0 }
0x11a6   : > { %p2993_p5 = scmp.ge.s32.totalorder %s2364_s27, 2  ;;  %s1717_s10 = scalar_lea.sflag [#allocation4], %s1716_s0 }
0x11a8   : > { %p2067_p3 = pnand %p2993_p5, %p2992_p4 }
0x11aa   : > { %2347 = dma.done.wait (!%p2067_p3), %s1717_s10, 128  }
0x11ab   : > { %2349 = vsyncadd (!%p2067_p3), %s1717_s10, 4294967168  ;;  %p24_p7 = scmp.ge.s32.totalorder %s2533_s13, 4   ;;  %s2994_s24 = smov %s2356_s25 }
0x11ac   : > { %s2995_s25 = smov %s2360_s26  ;;  %s2996_s26 = smov %s2549_s17 }
0x11ad   : > { %s2997_s27 = smov %s2533_s13  ;;  %26 = sbr.rel (!%p24_p7) target bundleno = 12 (0xc), region = 119 }
0x11b4   :  { %1722 = vsyncpa [#allocation3], 1 }
0x11b5   :  { %1724 = vsyncpa [#allocation3 + $0x1], 1 }
0x11b6   :  { %1725 = vsyncpa [#allocation6], 1 }
0x11b7   :  { %1727 = vsyncpa [#allocation6 + $0x1], 1 }
0x11b8   :  { %1728 = vsyncpa [#allocation9], 1 }
0x11b9   :  { %1729 = vsyncpa [#allocation4], 1 }
0x11ba   :  { %1731 = vsyncpa [#allocation4 + $0x1], 1 }

</bundles_post_ra>
